<compile_context>
chip_gen: v7x
topology: tpu7x:2x2x1
jax: 0.10.0
libtpu: 0.0.40
codegen_flags: <defaults>
</compile_context>

<pallas_src>
import numpy as np
import jax
import jax.numpy as jnp
from jax import lax
from jax.experimental import pallas as pl
from jax.experimental.pallas import tpu as pltpu


# ----------------------------------------------------------------------------
# Fused kernel
# ----------------------------------------------------------------------------
def _l2_normalize(x, eps=1e-12):
    # F.normalize(x, dim=-1) == x / max(||x||, eps), written divide-free with
    # an EUP rsqrt on the clamped sum-of-squares (same zero-vector guard).
    ssq = jnp.sum(x * x, axis=-1, keepdims=True)
    return x * lax.rsqrt(jnp.maximum(ssq, eps * eps))


def _siglip_fused_kernel(scale_ref,    # SMEM [1, 1]    f32   raw logit_scale
                         pooled_ref,   # VMEM [Bp, Cp]  f32   mean-pooled image
                         wbb_ref,      # VMEM [Cp, 2048] f32  trunk linear
                         bbb_ref,      # VMEM [1, 2048] f32
                         wfc_ref,      # VMEM [2048, E] f32   image_encoder.fc
                         bfc_ref,      # VMEM [1, E]    f32
                         tok_ref,      # VMEM [L, 1]    int32 last-token ids (padded)
                         tokproj_ref,  # VMEM [V, E]    f32   tok_embed@w_proj + b_proj
                         out_ref):     # VMEM [Bp, L]   f32   lane-dense logits slab
    L = tok_ref.shape[0]
    V = tokproj_ref.shape[0]

    # ---- image branch -------------------------------------------------------
    # TODO(synk): pretrained ResNet50 backbone has no in-script equivalent;
    # stand-in = global-avg-pool (wrapper) -> linear -> ReLU -> fc (here).
    feat = jnp.dot(pooled_ref[...], wbb_ref[...],
                   preferred_element_type=jnp.float32) + bbb_ref[...]
    feat = jnp.maximum(feat, 0.0)
    img_emb = jnp.dot(feat, wfc_ref[...],
                      preferred_element_type=jnp.float32) + bfc_ref[...]
    img_emb = _l2_normalize(img_emb)                                    # [Bp, E]

    # ---- text branch --------------------------------------------------------
    # TODO(synk): frozen pretrained Phi causal LM has no in-script equivalent;
    # stand-in: hidden_states[-1][:, -1, :] := embedding of the last token,
    # with the (frozen) embedding table and text_projection folded at init.
    # Vectorized one-hot MXU gather (no scalar loop, no scratch):
    ids = tok_ref[...]                                                  # [L, 1]
    iota = lax.broadcasted_iota(jnp.int32, (L, V), 1)
    one_hot = (iota == ids).astype(jnp.float32)                         # [L, V]
    txt_pre = jnp.dot(one_hot, tokproj_ref[...],
                      preferred_element_type=jnp.float32)               # [L, E]
    txt_emb = _l2_normalize(txt_pre)

    # ---- scaled similarity logits ------------------------------------------
    # Contract the last dims of both operands (no materialized transpose);
    # the text path already has L=128 rows so the output tile [Bp, 128] is a
    # lane-dense unmasked vst.  Columns >= B are slop; wrapper slices [:B,:B].
    logits = lax.dot_general(img_emb, txt_emb, (((1,), (1,)), ((), ())),
                             preferred_element_type=jnp.float32)        # [Bp, L]

    scale = jnp.exp(jnp.full((1, 1), scale_ref[0, 0], jnp.float32))     # EUP exp
    out_ref[...] = logits * scale


# ----------------------------------------------------------------------------
# Wrapper
# ----------------------------------------------------------------------------
_VMEM = pl.BlockSpec(memory_space=pltpu.MemorySpace.VMEM)
_SMEM = pl.BlockSpec(memory_space=pltpu.MemorySpace.SMEM)


def _round_up(x, m):
    return ((x + m - 1) // m) * m


def siglip_forward(params, image, text_tokens):
    """Returns (logits_per_image, logits_per_text), both [B, B] f32."""
    B, C, H, W = image.shape

    b_pad = _round_up(max(B, 1), 8)                 # sublane-tile batch
    c_pad = _round_up(C, 8)                         # channel pad for MXU K dim
    out_lanes = _round_up(max(b_pad, 128), 128)     # lane-dense logits slab

    # TODO(synk): ResNet50 trunk stand-in, step 1: global average pool (tiny,
    # done on the host side of the kernel; the linear+ReLU+fc run in-kernel).
    pooled = jnp.mean(image.astype(jnp.float32), axis=(2, 3))           # [B, C]
    pooled = jnp.pad(pooled, ((0, b_pad - B), (0, c_pad - C)))          # [Bp, Cp]
    w_bb = jnp.pad(params["w_bb"], ((0, c_pad - C), (0, 0)))            # [Cp, 2048]

    tok_last = text_tokens[:, -1].astype(jnp.int32)
    tok_last = jnp.pad(tok_last, (0, out_lanes - B)).reshape(out_lanes, 1)

    logits_pad = pl.pallas_call(
        _siglip_fused_kernel,
        out_shape=jax.ShapeDtypeStruct((b_pad, out_lanes), jnp.float32),
        in_specs=[_SMEM] + [_VMEM] * 7,
        out_specs=_VMEM,
    )(params["logit_scale"],
      pooled, w_bb, params["b_bb"],
      params["w_fc"], params["b_fc"],
      tok_last, params["tok_proj"])

    logits_per_image = logits_pad[:B, :B]
    logits_per_text = logits_per_image.T            # lt := li.T (as in the spec)
    return logits_per_image, logits_per_text


# ----------------------------------------------------------------------------
# Parameters
# ----------------------------------------------------------------------------
def init_params(key, in_ch=3, backbone_dim=2048, hidden_size=64,
                embedding_dim=32, vocab_size=128, temperature=0.07):
    k = jax.random.split(key, 4)
    tok_embed = jax.random.normal(k[2], (vocab_size, hidden_size), jnp.float32) * 0.02
    w_proj = jax.random.normal(k[3], (hidden_size, embedding_dim), jnp.float32) * 0.02
    b_proj = jnp.zeros((1, embedding_dim), jnp.float32)
    return {
        # ResNet50 trunk stand-in (mean-pool -> linear -> relu -> 2048-d feats).
        "w_bb": jax.random.normal(k[0], (in_ch, backbone_dim), jnp.float32) * 0.02,
        "b_bb": jnp.zeros((1, backbone_dim), jnp.float32),
        # image_encoder.fc = nn.Linear(2048, embedding_dim)
        "w_fc": jax.random.normal(k[1], (backbone_dim, embedding_dim), jnp.float32) * 0.02,
        "b_fc": jnp.zeros((1, embedding_dim), jnp.float32),
        # text model stand-in: token embedding table (hidden_size)
        "tok_embed": tok_embed,
        # text_projection = nn.Linear(hidden_size, embedding_dim)
        "w_proj": w_proj,
        "b_proj": b_proj,
        # Frozen embed + projection folded once at init (used by the kernel):
        #   tok_proj[v] = tok_embed[v] @ w_proj + b_proj
        "tok_proj": tok_embed @ w_proj + b_proj,
        # logit_scale = log(1 / temperature)
        "logit_scale": jnp.full((1, 1), np.log(1.0 / temperature), jnp.float32),
    }


if __name__ == "__main__":
    key = jax.random.PRNGKey(0)
    pkey, ikey, tkey = jax.random.split(key, 3)

    B, C, H, W = 2, 3, 16, 16
    S = 8
    params = init_params(pkey, in_ch=C)

    image = jax.random.normal(ikey, (B, C, H, W), jnp.float32)          # NCHW
    text_tokens = jax.random.randint(tkey, (B, S), 0, 128, jnp.int32)

    fwd = jax.jit(siglip_forward)
    logits_per_image, logits_per_text = fwd(params, image, text_tokens)
    jax.block_until_ready((logits_per_image, logits_per_text))

    # Pure-JAX reference (same math as the kernel, using the unfolded params).
    def ref_forward(params, image, text_tokens):
        pooled = image.mean(axis=(2, 3))
        feat = jnp.maximum(pooled @ params["w_bb"] + params["b_bb"], 0.0)
        iemb = feat @ params["w_fc"] + params["b_fc"]
        iemb = iemb / jnp.maximum(
            jnp.sqrt(jnp.sum(iemb * iemb, -1, keepdims=True)), 1e-12)
        hid = params["tok_embed"][text_tokens[:, -1]]
        temb = hid @ params["w_proj"] + params["b_proj"]
        temb = temb / jnp.maximum(
            jnp.sqrt(jnp.sum(temb * temb, -1, keepdims=True)), 1e-12)
        scale = jnp.exp(params["logit_scale"][0, 0])
        li = scale * iemb @ temb.T
        return li, li.T

    li_ref, lt_ref = ref_forward(params, image, text_tokens)
    assert np.allclose(np.asarray(logits_per_image), np.asarray(li_ref), atol=1e-3)
    assert np.allclose(np.asarray(logits_per_text), np.asarray(lt_ref), atol=1e-3)

    print("KERNEL_OK")
</pallas_src>

<mosaic_0001>
module attributes {stable_mosaic.version = 11 : i64} {
  func.func @_siglip_fused_kernel(%arg0: memref<1x1xf32, #tpu.memory_space<smem>>, %arg1: memref<8x8xf32, #tpu.memory_space<vmem>>, %arg2: memref<8x2048xf32, #tpu.memory_space<vmem>>, %arg3: memref<1x2048xf32, #tpu.memory_space<vmem>>, %arg4: memref<2048x32xf32, #tpu.memory_space<vmem>>, %arg5: memref<1x32xf32, #tpu.memory_space<vmem>>, %arg6: memref<128x1xi32, #tpu.memory_space<vmem>>, %arg7: memref<128x32xf32, #tpu.memory_space<vmem>>, %arg8: memref<8x128xf32, #tpu.memory_space<vmem>>) attributes {dimension_semantics = [], scalar_prefetch = 0 : i64, scratch_operands = 0 : i64, tpu.core_type = #tpu.core_type<tc>} {
    %c0 = arith.constant 0 : index
    %c0_0 = arith.constant 0 : index
    %0 = vector.load %arg1[%c0, %c0_0] : memref<8x8xf32, #tpu.memory_space<vmem>>, vector<8x8xf32>
    %c0_1 = arith.constant 0 : index
    %c0_2 = arith.constant 0 : index
    %1 = vector.load %arg2[%c0_1, %c0_2] : memref<8x2048xf32, #tpu.memory_space<vmem>>, vector<8x2048xf32>
    %cst = arith.constant dense<0.000000e+00> : vector<8x2048xf32>
    %2 = tpu.matmul %0, %1, %cst {dimension_numbers = #tpu.dot_dimension_numbers<[1], [0], [0], [1], [0, 0, 1, 1], [], []>} : vector<8x8xf32>, vector<8x2048xf32>, vector<8x2048xf32> -> vector<8x2048xf32>
    %c0_3 = arith.constant 0 : index
    %c0_4 = arith.constant 0 : index
    %3 = vector.load %arg3[%c0_3, %c0_4] : memref<1x2048xf32, #tpu.memory_space<vmem>>, vector<1x2048xf32>
    %4 = vector.broadcast %3 : vector<1x2048xf32> to vector<8x2048xf32>
    %5 = arith.addf %2, %4 : vector<8x2048xf32>
    %cst_5 = arith.constant 0.000000e+00 : f32
    %6 = vector.broadcast %cst_5 : f32 to vector<8x2048xf32>
    %7 = arith.maximumf %5, %6 : vector<8x2048xf32>
    %c0_6 = arith.constant 0 : index
    %c0_7 = arith.constant 0 : index
    %8 = vector.load %arg4[%c0_6, %c0_7] : memref<2048x32xf32, #tpu.memory_space<vmem>>, vector<2048x32xf32>
    %cst_8 = arith.constant dense<0.000000e+00> : vector<8x32xf32>
    %9 = tpu.matmul %7, %8, %cst_8 {dimension_numbers = #tpu.dot_dimension_numbers<[1], [0], [0], [1], [0, 0, 1, 1], [], []>} : vector<8x2048xf32>, vector<2048x32xf32>, vector<8x32xf32> -> vector<8x32xf32>
    %c0_9 = arith.constant 0 : index
    %c0_10 = arith.constant 0 : index
    %10 = vector.load %arg5[%c0_9, %c0_10] : memref<1x32xf32, #tpu.memory_space<vmem>>, vector<1x32xf32>
    %11 = vector.broadcast %10 : vector<1x32xf32> to vector<8x32xf32>
    %12 = arith.addf %9, %11 : vector<8x32xf32>
    %13 = arith.mulf %12, %12 : vector<8x32xf32>
    %cst_11 = arith.constant dense<0.000000e+00> : vector<8xf32>
    %14 = vector.multi_reduction <add>, %13, %cst_11 [1] : vector<8x32xf32> to vector<8xf32>
    %15 = vector.shape_cast %14 : vector<8xf32> to vector<8x1xf32>
    %cst_12 = arith.constant 1.000000e-24 : f32
    %16 = vector.broadcast %cst_12 : f32 to vector<8x1xf32>
    %17 = arith.maximumf %15, %16 : vector<8x1xf32>
    %18 = math.rsqrt %17 : vector<8x1xf32>
    %19 = vector.broadcast %18 : vector<8x1xf32> to vector<8x32xf32>
    %20 = arith.mulf %12, %19 : vector<8x32xf32>
    %c0_13 = arith.constant 0 : index
    %c0_14 = arith.constant 0 : index
    %21 = vector.load %arg6[%c0_13, %c0_14] : memref<128x1xi32, #tpu.memory_space<vmem>>, vector<128x1xi32>
    %22 = tpu.iota {dimensions = array<i32: 1>} : vector<128x128xi32>
    %23 = vector.broadcast %21 : vector<128x1xi32> to vector<128x128xi32>
    %24 = arith.cmpi eq, %22, %23 : vector<128x128xi32>
    %25 = arith.extui %24 : vector<128x128xi1> to vector<128x128xi32>
    %26 = arith.sitofp %25 : vector<128x128xi32> to vector<128x128xf32>
    %c0_15 = arith.constant 0 : index
    %c0_16 = arith.constant 0 : index
    %27 = vector.load %arg7[%c0_15, %c0_16] : memref<128x32xf32, #tpu.memory_space<vmem>>, vector<128x32xf32>
    %cst_17 = arith.constant dense<0.000000e+00> : vector<128x32xf32>
    %28 = tpu.matmul %26, %27, %cst_17 {dimension_numbers = #tpu.dot_dimension_numbers<[1], [0], [0], [1], [0, 0, 1, 1], [], []>} : vector<128x128xf32>, vector<128x32xf32>, vector<128x32xf32> -> vector<128x32xf32>
    %29 = arith.mulf %28, %28 : vector<128x32xf32>
    %cst_18 = arith.constant dense<0.000000e+00> : vector<128xf32>
    %30 = vector.multi_reduction <add>, %29, %cst_18 [1] : vector<128x32xf32> to vector<128xf32>
    %31 = vector.shape_cast %30 : vector<128xf32> to vector<128x1xf32>
    %cst_19 = arith.constant 1.000000e-24 : f32
    %32 = vector.broadcast %cst_19 : f32 to vector<128x1xf32>
    %33 = arith.maximumf %31, %32 : vector<128x1xf32>
    %34 = math.rsqrt %33 : vector<128x1xf32>
    %35 = vector.broadcast %34 : vector<128x1xf32> to vector<128x32xf32>
    %36 = arith.mulf %28, %35 : vector<128x32xf32>
    %cst_20 = arith.constant dense<0.000000e+00> : vector<8x128xf32>
    %37 = tpu.matmul %20, %36, %cst_20 {dimension_numbers = #tpu.dot_dimension_numbers<[1], [1], [0], [0], [0, 0, 1, 0], [], []>} : vector<8x32xf32>, vector<128x32xf32>, vector<8x128xf32> -> vector<8x128xf32>
    %c0_21 = arith.constant 0 : index
    %c0_22 = arith.constant 0 : index
    %38 = memref.load %arg0[%c0_21, %c0_22] : memref<1x1xf32, #tpu.memory_space<smem>>
    %39 = vector.broadcast %38 : f32 to vector<1x1xf32>
    %40 = math.exp %39 : vector<1x1xf32>
    %41 = vector.broadcast %40 : vector<1x1xf32> to vector<8x128xf32>
    %42 = arith.mulf %37, %41 : vector<8x128xf32>
    %c0_23 = arith.constant 0 : index
    %c0_24 = arith.constant 0 : index
    %43 = vector.load %arg8[%c0_23, %c0_24] : memref<8x128xf32, #tpu.memory_space<vmem>>, vector<8x128xf32>
    tpu.vector_store %arg8[%c0_23, %c0_24], %42 {strides = array<i32>} : memref<8x128xf32, #tpu.memory_space<vmem>>, vector<8x128xf32>,
    return
  }
}

</mosaic_0001>

<bundles_post_ra>
// kernel: siglip_forward.1
= control target key start
LH: loop header
LB: loop body
LE: loop exit
PB: predicated region body
PF: predicated region fallthrough
CT: control target
= control target key end

     0   :  { %v2909_v2 = vmov 0.0   ;;  %vm131_vm0 = vcmask 64512   ;;  %v2910_v7 = vmov 0   ;;  %s4174_s2 = inlined_call_operand.vmem [shape: f32[8,2048], index: 2, kind: input, shape index: {}]   ;;  %s4175_s1 = inlined_call_operand.vmem [shape: f32[8,8], index: 1, kind: input, shape index: {}]   ;;  %s4176_s4 = inlined_call_operand.vmem [shape: f32[2048,32], index: 4, kind: input, shape index: {}]   ;;  %s4177_s6 = inlined_call_operand.vmem [shape: s32[128,1], index: 6, kind: input, shape index: {}]   ;;  %s4178_s3 = inlined_call_operand.vmem [shape: f32[1,2048], index: 3, kind: input, shape index: {}]   ;;  %s4179_s7 = inlined_call_operand.vmem [shape: f32[128,32], index: 7, kind: input, shape index: {}]   ;;  %s4180_s5 = inlined_call_operand.vmem [shape: f32[1,32], index: 5, kind: input, shape index: {}]   ;;  %s4181_s0 = inlined_call_operand.<no memory space> [shape: f32[1,1], index: 0, kind: input, shape index: {}]   ;;  %s4182_s8 = inlined_call_operand.vmem [shape: f32[8,128], index: 8, kind: output, shape index: {}]  }
   0x1   :  { %v32_v0 = vld [vmem:[%s4174_s2 + $0x8] sm:$0xff]  ;;  %v31_v1 = vld [vmem:[%s4174_s2] sm:$0xff]  ;;  %199 = vmatprep.mubr.f32.mxu0 %v2909_v2  ;;  %270 = vmatprep.mubr.f32.mxu1 %v2909_v2  ;;  %v34_v4 = vld [vmem:[%s4174_s2 + $0x18] sm:$0xff] }
   0x2   :  { %v2969_v3 = vld [vmem:[%s4175_s1] sm:$0xff]  ;;  %135 = vmatprep.subr.mxu0 %v32_v0  ;;  %v33_v5 = vld [vmem:[%s4174_s2 + $0x10] sm:$0xff]  ;;  %v36_v6 = vld [vmem:[%s4174_s2 + $0x28] sm:$0xff]  ;;  %2871 = vset.pattern.permute.xlu0 %v2910_v7 }
   0x3   :  { %136 = vmatpush1.msra.mxu0 %v31_v1  ;;  %206 = vmatprep.subr.mxu1 %v34_v4  ;;  %v35_v8 = vld [vmem:[%s4174_s2 + $0x20] sm:$0xff]  ;;  %v38_v9 = vld [vmem:[%s4174_s2 + $0x38] sm:$0xff]  ;;  %v37_v10 = vld [vmem:[%s4174_s2 + $0x30] sm:$0xff] }
   0x4   :  { %2068 = vmatmul.mubr.msk.f32.vlgmr.msra.gmra.mrb[0].mxu0 %vm131_vm0, %v2969_v3  ;;  %207 = vmatpush1.msra.mxu1 %v33_v5  ;;  %v40_v11 = vld [vmem:[%s4174_s2 + $0x48] sm:$0xff]  ;;  %v39_v12 = vld [vmem:[%s4174_s2 + $0x40] sm:$0xff]  ;;  %v42_v13 = vld [vmem:[%s4174_s2 + $0x58] sm:$0xff] }
   0x5   :  { %2069 = vmatmul.mubr.msk.f32.vlgmr.msra.gmra.mrb[0].mxu1 %vm131_vm0, %v2969_v3  ;;  %277 = vmatprep.subr.mxu0 %v36_v6  ;;  %v41_v14 = vld [vmem:[%s4174_s2 + $0x50] sm:$0xff]  ;;  %v44_v15 = vld [vmem:[%s4174_s2 + $0x68] sm:$0xff]  ;;  %v43_v16 = vld [vmem:[%s4174_s2 + $0x60] sm:$0xff] }
   0x6   :  { %278 = vmatpush1.msra.mxu0 %v35_v8  ;;  %341 = vmatprep.mubr.f32.mxu0 %v2909_v2  ;;  %v46_v17 = vld [vmem:[%s4174_s2 + $0x78] sm:$0xff]  ;;  %v735_v18 = vld [vmem:[%s4176_s4 + $0x80] sm:$0xff]  ;;  %v736_v19 = vld [vmem:[%s4176_s4 + $0x88] sm:$0xff] }
   0x7   :  { %348 = vmatprep.subr.mxu1 %v38_v9  ;;  %412 = vmatprep.mubr.f32.mxu1 %v2909_v2  ;;  %v719_v20 = vld [vmem:[%s4176_s4] sm:$0xff]  ;;  %v720_v21 = vld [vmem:[%s4176_s4 + $0x8] sm:$0xff]  ;;  %v45_v24 = vld [vmem:[%s4174_s2 + $0x70] sm:$0xff]  ;;  %v2546_v28 = vpack.c.bf16 %v736_v19, %v735_v18 }
   0x8   :  { %2070 = vmatmul.mubr.msk.f32.vlgmr.msra.gmra.mrb[2].mxu0 %vm131_vm0, %v2969_v3  ;;  %349 = vmatpush1.msra.mxu1 %v37_v10  ;;  %v767_v22 = vld [vmem:[%s4176_s4 + $0x180] sm:$0xff]  ;;  %v768_v23 = vld [vmem:[%s4176_s4 + $0x188] sm:$0xff]  ;;  %v737_v29 = vld [vmem:[%s4176_s4 + $0x90] sm:$0xff]  ;;  %v2548_v31 = vpack.c.bf16 %v720_v21, %v719_v20 }
   0x9   :  { %2071 = vmatmul.mubr.msk.f32.vlgmr.msra.gmra.mrb[2].mxu1 %vm131_vm0, %v2969_v3  ;;  %419 = vmatprep.subr.mxu0 %v40_v11  ;;  %v751_v25 = vld [vmem:[%s4176_s4 + $0x100] sm:$0xff]  ;;  %v752_v26 = vld [vmem:[%s4176_s4 + $0x108] sm:$0xff]  ;;  %v738_v30 = vld [vmem:[%s4176_s4 + $0x98] sm:$0xff]  ;;  %v2578_v32 = vpack.c.bf16 %v768_v23, %v767_v22 }
   0xa   :  { %420 = vmatpush1.msra.mxu0 %v39_v12  ;;  %483 = vmatprep.mubr.f32.mxu0 %v2909_v2  ;;  %v1550_v27 = vld [vmem:[%s4177_s6] sm:$0xff]  ;;  %v769_v33 = vld [vmem:[%s4176_s4 + $0x190] sm:$0xff]  ;;  %v770_v34 = vld [vmem:[%s4176_s4 + $0x198] sm:$0xff]  ;;  %v2580_v35 = vpack.c.bf16 %v752_v26, %v751_v25  ;;  %v2550_v39 = vpack.c.bf16 %v738_v30, %v737_v29 }
   0xb   :  { %490 = vmatprep.subr.mxu1 %v42_v13  ;;  %554 = vmatprep.mubr.f32.mxu1 %v2909_v2  ;;  %v721_v36 = vld [vmem:[%s4176_s4 + $0x10] sm:$0xff]  ;;  %v722_v37 = vld [vmem:[%s4176_s4 + $0x18] sm:$0xff]  ;;  %v1551_v42 = vld [vmem:[%s4177_s6 + $0x8] sm:$0xff]  ;;  %v2582_v43 = vpack.c.bf16 %v770_v34, %v769_v33 }
   0xc   :  { %2072 = vmatmul.mubr.msk.f32.vlgmr.msra.gmra.mrb[4].mxu0 %vm131_vm0, %v2969_v3  ;;  %491 = vmatpush1.msra.mxu1 %v41_v14  ;;  %v1552_v38 = vld [vmem:[%s4177_s6 + $0x10] sm:$0xff]  ;;  %v754_v41 = vld [vmem:[%s4176_s4 + $0x118] sm:$0xff]  ;;  %v739_v44 = vld [vmem:[%s4176_s4 + $0xa0] sm:$0xff]  ;;  %v2552_v46 = vpack.c.bf16 %v722_v37, %v721_v36 }
   0xd   :  { %2073 = vmatmul.mubr.msk.f32.vlgmr.msra.gmra.mrb[4].mxu1 %vm131_vm0, %v2969_v3  ;;  %561 = vmatprep.subr.mxu0 %v44_v15  ;;  %v753_v40 = vld [vmem:[%s4176_s4 + $0x110] sm:$0xff]  ;;  %v740_v45 = vld [vmem:[%s4176_s4 + $0xa8] sm:$0xff]  ;;  %v771_v47 = vld [vmem:[%s4176_s4 + $0x1a0] sm:$0xff] }
   0xe   :  { %562 = vmatpush1.msra.mxu0 %v43_v16  ;;  %625 = vmatprep.mubr.f32.mxu0 %v2909_v2  ;;  %v772_v48 = vld [vmem:[%s4176_s4 + $0x1a8] sm:$0xff]  ;;  %v2584_v49 = vpack.c.bf16 %v754_v41, %v753_v40  ;;  %v723_v50 = vld [vmem:[%s4176_s4 + $0x20] sm:$0xff]  ;;  %v1553_v52 = vld [vmem:[%s4177_s6 + $0x18] sm:$0xff]  ;;  %v2554_v53 = vpack.c.bf16 %v740_v45, %v739_v44 }
   0xf   :  { %632 = vmatprep.subr.mxu1 %v46_v17  ;;  %696 = vmatprep.mubr.f32.mxu1 %v2909_v2  ;;  %v724_v51 = vld [vmem:[%s4176_s4 + $0x28] sm:$0xff]  ;;  %v755_v54 = vld [vmem:[%s4176_s4 + $0x120] sm:$0xff]  ;;  %v2586_v57 = vpack.c.bf16 %v772_v48, %v771_v47  ;;  %v741_v58 = vld [vmem:[%s4176_s4 + $0xb0] sm:$0xff] }
  0x10   :  { %2074 = vmatmul.mubr.msk.f32.vlgmr.msra.gmra.mrb[6].mxu0 %vm131_vm0, %v2969_v3  ;;  %633 = vmatpush1.msra.mxu1 %v45_v24  ;;  %v756_v55 = vld [vmem:[%s4176_s4 + $0x128] sm:$0xff]  ;;  %v1554_v56 = vld [vmem:[%s4177_s6 + $0x20] sm:$0xff]  ;;  %v742_v59 = vld [vmem:[%s4176_s4 + $0xb8] sm:$0xff]  ;;  %v2556_v60 = vpack.c.bf16 %v724_v51, %v723_v50 }
  0x11   :  { %2075 = vmatmul.mubr.msk.f32.vlgmr.msra.gmra.mrb[6].mxu1 %vm131_vm0, %v2969_v3  ;;  %1569 = vperm.xlu0 %2871, %v1550_v27   ;;  %v773_v61 = vld [vmem:[%s4176_s4 + $0x1b0] sm:$0xff]  ;;  %v774_v62 = vld [vmem:[%s4176_s4 + $0x1b8] sm:$0xff]  ;;  %v2588_v63 = vpack.c.bf16 %v756_v55, %v755_v54  ;;  %v1555_v3 = vld [vmem:[%s4177_s6 + $0x28] sm:$0xff]  ;;  %v2558_v4 = vpack.c.bf16 %v742_v59, %v741_v58 }
  0x12   :  { %2547 = vmatprep.subr.bf16.mxu0 %v2546_v28  ;;  %2872 = vset.pattern.permute.xlu1 %v2910_v7  ;;  %v725_v0 = vld [vmem:[%s4176_s4 + $0x30] sm:$0xff]  ;;  %v726_v1 = vld [vmem:[%s4176_s4 + $0x38] sm:$0xff]  ;;  %v2590_v8 = vpack.c.bf16 %v774_v62, %v773_v61  ;;  %v743_v9 = vld [vmem:[%s4176_s4 + $0xc0] sm:$0xff] }
  0x13   :  { %2549 = vmatpush3.bf16.msra.mxu0 %v2548_v31  ;;  %2579 = vmatprep.subr.bf16.mxu1 %v2578_v32  ;;  %v757_v5 = vld [vmem:[%s4176_s4 + $0x130] sm:$0xff]  ;;  %v758_v6 = vld [vmem:[%s4176_s4 + $0x138] sm:$0xff]  ;;  %v744_v10 = vld [vmem:[%s4176_s4 + $0xc8] sm:$0xff]  ;;  %v2560_v11 = vpack.c.bf16 %v726_v1, %v725_v0 }
  0x14   :  { %1575 = vperm.xlu1 %2872, %v1552_v38   ;;  %2581 = vmatpush3.bf16.msra.mxu1 %v2580_v35  ;;  %v1556_v7 = vld [vmem:[%s4177_s6 + $0x30] sm:$0xff]  ;;  %v775_v12 = vld [vmem:[%s4176_s4 + $0x1c0] sm:$0xff]  ;;  %v776_v13 = vld [vmem:[%s4176_s4 + $0x1c8] sm:$0xff]  ;;  %v2592_v14 = vpack.c.bf16 %v758_v6, %v757_v5  ;;  %v2562_v18 = vpack.c.bf16 %v744_v10, %v743_v9 }
  0x15   :  { %1572 = vperm.xlu0 %2871, %v1551_v42   ;;  %2551 = vmatprep.subr.bf16.mxu0 %v2550_v39  ;;  %v727_v15 = vld [vmem:[%s4176_s4 + $0x40] sm:$0xff]  ;;  %v728_v16 = vld [vmem:[%s4176_s4 + $0x48] sm:$0xff]  ;;  %v1557_v17 = vld [vmem:[%s4177_s6 + $0x38] sm:$0xff]  ;;  %v2594_v22 = vpack.c.bf16 %v776_v13, %v775_v12 }
  0x16   :  { %2583 = vmatprep.subr.bf16.mxu1 %v2582_v43  ;;  %v759_v19 = vld [vmem:[%s4176_s4 + $0x140] sm:$0xff]  ;;  %v760_v20 = vld [vmem:[%s4176_s4 + $0x148] sm:$0xff]  ;;  %v745_v23 = vld [vmem:[%s4176_s4 + $0xd0] sm:$0xff]  ;;  %v2564_v25 = vpack.c.bf16 %v728_v16, %v727_v15 }
  0x17   :  { %2553 = vmatpush3.bf16.msra.mxu0 %v2552_v46  ;;  %v1558_v21 = vld [vmem:[%s4177_s6 + $0x40] sm:$0xff]  ;;  %v746_v24 = vld [vmem:[%s4176_s4 + $0xd8] sm:$0xff]  ;;  %v777_v26 = vld [vmem:[%s4176_s4 + $0x1d0] sm:$0xff]  ;;  %v2596_v28 = vpack.c.bf16 %v760_v20, %v759_v19 }
  0x18   :  { %1578 = vperm.xlu1 %2872, %v1553_v52   ;;  %2585 = vmatpush3.bf16.msra.mxu1 %v2584_v49  ;;  %v778_v27 = vld [vmem:[%s4176_s4 + $0x1d8] sm:$0xff]  ;;  %v729_v29 = vld [vmem:[%s4176_s4 + $0x50] sm:$0xff]  ;;  %v1559_v31 = vld [vmem:[%s4177_s6 + $0x48] sm:$0xff]  ;;  %v2566_v32 = vpack.c.bf16 %v746_v24, %v745_v23 }
  0x19   :  { %1581 = vperm.xlu0 %2871, %v1554_v56   ;;  %2555 = vmatprep.subr.bf16.mxu0 %v2554_v53  ;;  %v730_v30 = vld [vmem:[%s4176_s4 + $0x58] sm:$0xff]  ;;  %v761_v33 = vld [vmem:[%s4176_s4 + $0x150] sm:$0xff]  ;;  %v2598_v36 = vpack.c.bf16 %v778_v27, %v777_v26  ;;  %v747_v37 = vld [vmem:[%s4176_s4 + $0xe0] sm:$0xff] }
  0x1a   :  { %2587 = vmatprep.subr.bf16.mxu1 %v2586_v57  ;;  %v762_v34 = vld [vmem:[%s4176_s4 + $0x158] sm:$0xff]  ;;  %v1560_v35 = vld [vmem:[%s4177_s6 + $0x50] sm:$0xff]  ;;  %v748_v38 = vld [vmem:[%s4176_s4 + $0xe8] sm:$0xff]  ;;  %v2568_v39 = vpack.c.bf16 %v730_v30, %v729_v29 }
  0x1b   :  { %2557 = vmatpush3.bf16.msra.mxu0 %v2556_v60  ;;  %v2600_v40 = vpack.c.bf16 %v762_v34, %v761_v33  ;;  %v731_v41 = vld [vmem:[%s4176_s4 + $0x60] sm:$0xff]  ;;  %v732_v42 = vld [vmem:[%s4176_s4 + $0x68] sm:$0xff]  ;;  %v1561_v43 = vld [vmem:[%s4177_s6 + $0x58] sm:$0xff]  ;;  %v2570_v44 = vpack.c.bf16 %v748_v38, %v747_v37 }
  0x1c   :  { %1584 = vperm.xlu1 %2872, %v1555_v3   ;;  %2589 = vmatpush3.bf16.msra.mxu1 %v2588_v63  ;;  %v1562_v45 = vld [vmem:[%s4177_s6 + $0x60] sm:$0xff]  ;;  %v2572_v46 = vpack.c.bf16 %v732_v42, %v731_v41  ;;  %v780_v48 = vld [vmem:[%s4176_s4 + $0x1e8] sm:$0xff]  ;;  %v749_v53 = vld [vmem:[%s4176_s4 + $0xf0] sm:$0xff] }
  0x1d   :  { %1587 = vperm.xlu0 %2871, %v1556_v7   ;;  %2559 = vmatprep.subr.bf16.mxu0 %v2558_v4  ;;  %v779_v47 = vld [vmem:[%s4176_s4 + $0x1e0] sm:$0xff]  ;;  %v764_v51 = vld [vmem:[%s4176_s4 + $0x168] sm:$0xff]  ;;  %v750_v54 = vld [vmem:[%s4176_s4 + $0xf8] sm:$0xff] }
  0x1e   :  { %2591 = vmatprep.subr.bf16.mxu1 %v2590_v8  ;;  %v2602_v49 = vpack.c.bf16 %v780_v48, %v779_v47  ;;  %v763_v50 = vld [vmem:[%s4176_s4 + $0x160] sm:$0xff]  ;;  %v1563_v55 = vld [vmem:[%s4177_s6 + $0x68] sm:$0xff]  ;;  %v1564_v56 = vld [vmem:[%s4177_s6 + $0x70] sm:$0xff]  ;;  %v2574_v57 = vpack.c.bf16 %v750_v54, %v749_v53 }
  0x1f   :  { %2561 = vmatpush3.bf16.msra.mxu0 %v2560_v11  ;;  %v2604_v52 = vpack.c.bf16 %v764_v51, %v763_v50  ;;  %v733_v58 = vld [vmem:[%s4176_s4 + $0x70] sm:$0xff]  ;;  %v734_v59 = vld [vmem:[%s4176_s4 + $0x78] sm:$0xff]  ;;  %v799_v4 = vld [vmem:[%s4176_s4 + $0x280] sm:$0xff]  ;;  %v51_v11 = vlaneseq }
  0x20   :  { %1590 = vperm.xlu1 %2872, %v1557_v17   ;;  %2593 = vmatpush3.bf16.msra.mxu1 %v2592_v14  ;;  %v781_v60 = vld [vmem:[%s4176_s4 + $0x1f0] sm:$0xff]  ;;  %v782_v61 = vld [vmem:[%s4176_s4 + $0x1f8] sm:$0xff]  ;;  %v2576_v62 = vpack.c.bf16 %v734_v59, %v733_v58  ;;  %v800_v5 = vld [vmem:[%s4176_s4 + $0x288] sm:$0xff] }
  0x21   :  { %1593 = vperm.xlu0 %2871, %v1558_v21   ;;  %2563 = vmatprep.subr.bf16.mxu0 %v2562_v18  ;;  %v2606_v63 = vpack.c.bf16 %v782_v61, %v781_v60  ;;  %v765_v0 = vld [vmem:[%s4176_s4 + $0x170] sm:$0xff]  ;;  %v766_v1 = vld [vmem:[%s4176_s4 + $0x178] sm:$0xff]  ;;  %v2610_v7 = vpack.c.bf16 %v800_v5, %v799_v4  ;;  %v831_v8 = vld [vmem:[%s4176_s4 + $0x380] sm:$0xff]  ;;  %v3291_v12 = vshrl.u32 %v51_v11, 7 }
  0x22   :  { %2595 = vmatprep.subr.bf16.mxu1 %v2594_v22  ;;  %v2608_v3 = vpack.c.bf16 %v766_v1, %v765_v0  ;;  %v1565_v6 = vld [vmem:[%s4177_s6 + $0x78] sm:$0xff]  ;;  %v832_v9 = vld [vmem:[%s4176_s4 + $0x388] sm:$0xff]  ;;  %v3297_v14 = vld [vmem:[%s4178_s3] sm:$0xff] }
  0x23   :  { %2565 = vmatpush3.bf16.msra.mxu0 %v2564_v25  ;;  %v2642_v10 = vpack.c.bf16 %v832_v9, %v831_v8  ;;  %v53_v13 = vsub.s32 0, %v3291_v12  ;;  %v57_v15 = vsub.s32 1, %v3291_v12  ;;  %v61_v16 = vsub.s32 2, %v3291_v12  ;;  %v783_v25 = vld [vmem:[%s4176_s4 + $0x200] sm:$0xff]  ;;  %v784_v29 = vld [vmem:[%s4176_s4 + $0x208] sm:$0xff]  ;;  %v833_v41 = vld [vmem:[%s4176_s4 + $0x390] sm:$0xff] }
  0x24   :  { %1596 = vperm.xlu1 %2872, %v1559_v31   ;;  %2597 = vmatpush3.bf16.msra.mxu1 %v2596_v28  ;;  %v65_v17 = vsub.s32 3, %v3291_v12  ;;  %v73_v21 = vsub.s32 5, %v3291_v12  ;;  %v81_v23 = vsub.s32 7, %v3291_v12  ;;  %v815_v30 = vld [vmem:[%s4176_s4 + $0x300] sm:$0xff]  ;;  %v816_v31 = vld [vmem:[%s4176_s4 + $0x308] sm:$0xff]  ;;  %v834_v42 = vld [vmem:[%s4176_s4 + $0x398] sm:$0xff] }
  0x25   :  { %1599 = vperm.xlu0 %2871, %v1560_v35   ;;  %2567 = vmatprep.subr.bf16.mxu0 %v2566_v32  ;;  %v54_v18 = vrot.slane %v3297_v14, %v53_v13  ;;  %v58_v19 = vrot.slane %v3297_v14, %v57_v15  ;;  %v62_v20 = vrot.slane %v3297_v14, %v61_v16  ;;  %v801_v35 = vld [vmem:[%s4176_s4 + $0x290] sm:$0xff]  ;;  %v3336_v38 = vld [vmem:[%s4178_s3 + $0x8] sm:$0xff]  ;;  %v786_v48 = vld [vmem:[%s4176_s4 + $0x218] sm:$0xff]  ;;  %v69_v4 = vsub.s32 4, %v3291_v12 }
  0x26   :  { %2599 = vmatprep.subr.bf16.mxu1 %v2598_v36  ;;  %v66_v22 = vrot.slane %v3297_v14, %v65_v17  ;;  %v802_v36 = vld [vmem:[%s4176_s4 + $0x298] sm:$0xff]  ;;  %v74_v37 = vrot.slane %v3297_v14, %v73_v21  ;;  %v2644_v47 = vpack.c.bf16 %v816_v31, %v815_v30  ;;  %v86_v59 = vrot.slane %v3336_v38, %v53_v13  ;;  %v835_v61 = vld [vmem:[%s4176_s4 + $0x3a0] sm:$0xff] }
  0x27   :  { %2569 = vmatpush3.bf16.msra.mxu0 %v2568_v39  ;;  %v818_v50 = vld [vmem:[%s4176_s4 + $0x318] sm:$0xff]  ;;  %v2614_v54 = vpack.c.bf16 %v802_v36, %v801_v35  ;;  %v2646_v60 = vpack.c.bf16 %v834_v42, %v833_v41  ;;  %v94_v1 = vrot.slane %v3336_v38, %v61_v16  ;;  %v77_v9 = vsub.s32 6, %v3291_v12  ;;  %v787_v13 = vld [vmem:[%s4176_s4 + $0x220] sm:$0xff]  ;;  %v788_v16 = vld [vmem:[%s4176_s4 + $0x228] sm:$0xff] }
  0x28   :  { %1602 = vperm.xlu1 %2872, %v1561_v43   ;;  %2601 = vmatpush3.bf16.msra.mxu1 %v2600_v40  ;;  %v3341_v40 = vld [vmem:[%s4176_s4 + $0x210] sm:$0xff]  ;;  %v82_v43 = vrot.slane %v3297_v14, %v81_v23  ;;  %v838_v35 = vld [vmem:[%s4176_s4 + $0x3b8] sm:$0xff]  ;;  %v114_v36 = vrot.slane %v3336_v38, %v81_v23  ;;  %v879_v12 = vld [vmem:[%s4176_s4 + $0x500] sm:$0xff] }
  0x29   :  { %1605 = vperm.xlu0 %2871, %v1562_v45   ;;  %2571 = vmatprep.subr.bf16.mxu0 %v2570_v44  ;;  %v789_v41 = vld [vmem:[%s4176_s4 + $0x230] sm:$0xff]  ;;  %v790_v42 = vld [vmem:[%s4176_s4 + $0x238] sm:$0xff] }
  0x2a   :  { %2603 = vmatprep.subr.bf16.mxu1 %v2602_v49  ;;  %v817_v49 = vld [vmem:[%s4176_s4 + $0x310] sm:$0xff] }
  0x2b   :  { %2573 = vmatpush3.bf16.msra.mxu0 %v2572_v46  ;;  %v2612_v46 = vpack.c.bf16 %v784_v29, %v783_v25  ;;  %v806_v29 = vld [vmem:[%s4176_s4 + $0x2b8] sm:$0xff] }
  0x2c   :  { %1608 = vperm.xlu1 %2872, %v1563_v55   ;;  %2605 = vmatpush3.bf16.msra.mxu1 %v2604_v52  ;;  %v803_v55 = vld [vmem:[%s4176_s4 + $0x2a0] sm:$0xff] }
  0x2d   :  { %1611 = vperm.xlu0 %2871, %v1564_v56   ;;  %2575 = vmatprep.subr.bf16.mxu0 %v2574_v57  ;;  %v804_v56 = vld [vmem:[%s4176_s4 + $0x2a8] sm:$0xff] }
  0x2e   :  { %2607 = vmatprep.subr.bf16.mxu1 %v2606_v63 }
  0x2f   :  { %2577 = vmatpush3.bf16.msra.mxu0 %v2576_v62  ;;  %v836_v62 = vld [vmem:[%s4176_s4 + $0x3a8] sm:$0xff] }
  0x30   :  { %1614 = vperm.xlu1 %2872, %v1565_v6   ;;  %2609 = vmatpush3.bf16.msra.mxu1 %v2608_v3  ;;  %v2616_v3 = vpack.c.bf16 %v786_v48, %v3341_v40  ;;  %v2648_v6 = vpack.c.bf16 %v818_v50, %v817_v49  ;;  %v807_v48 = vld [vmem:[%s4176_s4 + $0x2c0] sm:$0xff]  ;;  %v808_v49 = vld [vmem:[%s4176_s4 + $0x2c8] sm:$0xff] }
  0x31   :  { %2611 = vmatprep.subr.bf16.mxu0 %v2610_v7  ;;  %2643 = vmatprep.subr.bf16.mxu1 %v2642_v10  ;;  %v2618_v7 = vpack.c.bf16 %v804_v56, %v803_v55  ;;  %v840_v55 = vld [vmem:[%s4176_s4 + $0x3c8] sm:$0xff] }
  0xd7   :  { %v201_v24 = vpop.f32.mrb[0].mxu0 }
  0xd8   :  { %v202_v26 = vadd.f32 %v201_v24, %v54_v18  ;;  %v203_v27 = vpop.f32.mrb[1].mxu0  ;;  %v272_v28 = vpop.f32.mrb[0].mxu1  ;;  %v2650_v18 = vpack.c.bf16 %v836_v62, %v835_v61  ;;  %v791_v61 = vld [vmem:[%s4176_s4 + $0x240] sm:$0xff]  ;;  %v792_v62 = vld [vmem:[%s4176_s4 + $0x248] sm:$0xff] }
  0xd9   :  { %v204_v32 = vadd.f32 %v203_v27, %v58_v19  ;;  %v273_v33 = vadd.f32 %v272_v28, %v62_v20  ;;  %v274_v34 = vpop.f32.mrb[1].mxu1  ;;  %v819_v19 = vld [vmem:[%s4176_s4 + $0x320] sm:$0xff]  ;;  %v820_v27 = vld [vmem:[%s4176_s4 + $0x328] sm:$0xff]  ;;  %v805_v28 = vld [vmem:[%s4176_s4 + $0x2b0] sm:$0xff] }
  0xda   :  { %v275_v39 = vadd.f32 %v274_v34, %v66_v22  ;;  %v703_v52 = vmax.f32 %v202_v26, 0.0  ;;  %v102_v26 = vrot.slane %v3336_v38, %v69_v4  ;;  %v837_v34 = vld [vmem:[%s4176_s4 + $0x3b0] sm:$0xff]  ;;  %v2622_v40 = vpack.c.bf16 %v806_v29, %v805_v28  ;;  %v843_v28 = vld [vmem:[%s4176_s4 + $0x3e0] sm:$0xff]  ;;  %v844_v29 = vld [vmem:[%s4176_s4 + $0x3e8] sm:$0xff] }
  0xdb   :  { %v704_v44 = vmax.f32 %v204_v32, 0.0  ;;  %v705_v45 = vmax.f32 %v273_v33, 0.0  ;;  %v3361_v51 = vpop.f32.mrb[2].mxu0  ;;  %v106_v32 = vrot.slane %v3336_v38, %v73_v21  ;;  %v110_v33 = vrot.slane %v3336_v38, %v77_v9 }
  0xdc   :  { %v706_v53 = vmax.f32 %v275_v39, 0.0  ;;  %v345_v57 = vpop.f32.mrb[3].mxu0  ;;  %v3369_v58 = vpop.f32.mrb[2].mxu1  ;;  %v2652_v39 = vpack.c.bf16 %v820_v27, %v819_v19  ;;  %v825_v19 = vld [vmem:[%s4176_s4 + $0x350] sm:$0xff]  ;;  %v812_v27 = vld [vmem:[%s4176_s4 + $0x2e8] sm:$0xff] }
  0xdd   :  { %1046 = vmatprep.mubr.f32.mxu0 %v704_v44  ;;  %v346_v63 = vadd.f32 %v345_v57, %v74_v37  ;;  %v416_v0 = vpop.f32.mrb[3].mxu1  ;;  %v2620_v37 = vpack.c.bf16 %v788_v16, %v787_v13  ;;  %v2624_v57 = vpack.c.bf16 %v790_v42, %v789_v41  ;;  %v793_v16 = vld [vmem:[%s4176_s4 + $0x250] sm:$0xff]  ;;  %v814_v41 = vld [vmem:[%s4176_s4 + $0x2f8] sm:$0xff]  ;;  %v70_v42 = vrot.slane %v3297_v14, %v69_v4 }
  0xde   :  { %1047 = vmatmul.mubr.f32.vlgmr.msra.gmra.mrb[8].mxu0 %v703_v52  ;;  %1116 = vmatprep.mubr.f32.mxu1 %v706_v53  ;;  %v417_v5 = vadd.f32 %v416_v0, %v82_v43  ;;  %v821_v43 = vld [vmem:[%s4176_s4 + $0x330] sm:$0xff] }
  0xdf   :  { %2613 = vmatpush3.bf16.msra.mxu0 %v2612_v46  ;;  %1117 = vmatmul.mubr.f32.vlgmr.msra.gmra.mrb[8].mxu1 %v705_v45  ;;  %v708_v8 = vmax.f32 %v346_v63, 0.0  ;;  %v485_v10 = vpop.f32.mrb[4].mxu0  ;;  %v2654_v46 = vpack.c.bf16 %v838_v35, %v837_v34  ;;  %v823_v63 = vld [vmem:[%s4176_s4 + $0x340] sm:$0xff]  ;;  %v797_v4 = vld [vmem:[%s4176_s4 + $0x270] sm:$0xff] }
  0xe0   :  { %2645 = vmatpush3.bf16.msra.mxu1 %v2644_v47  ;;  %2615 = vmatprep.subr.bf16.mxu0 %v2614_v54  ;;  %v710_v20 = vmax.f32 %v417_v5, 0.0  ;;  %v3391_v22 = vadd.f32 %v485_v10, %v86_v59  ;;  %v3393_v24 = vpop.f32.mrb[5].mxu0  ;;  %v556_v25 = vpop.f32.mrb[4].mxu1  ;;  %v822_v47 = vld [vmem:[%s4176_s4 + $0x338] sm:$0xff]  ;;  %v839_v54 = vld [vmem:[%s4176_s4 + $0x3c0] sm:$0xff] }
  0xe1   :  { %2647 = vmatprep.subr.bf16.mxu1 %v2646_v60  ;;  %1186 = vmatprep.mubr.f32.mxu0 %v708_v8  ;;  %v3407_v30 = vadd.f32 %v556_v25, %v94_v1  ;;  %v3409_v31 = vpop.f32.mrb[5].mxu1  ;;  %v2656_v59 = vpack.c.bf16 %v822_v47, %v821_v43  ;;  %v2626_v60 = vpack.c.bf16 %v808_v49, %v807_v48  ;;  %v824_v1 = vld [vmem:[%s4176_s4 + $0x348] sm:$0xff]  ;;  %v810_v5 = vld [vmem:[%s4176_s4 + $0x2d8] sm:$0xff]  ;;  %v795_v35 = vld [vmem:[%s4176_s4 + $0x260] sm:$0xff] }
  0xe2   :  { %1256 = vmatprep.mubr.f32.mxu1 %v710_v20  ;;  %v2658_v0 = vpack.c.bf16 %v840_v55, %v839_v54  ;;  %v2628_v8 = vpack.c.bf16 %v792_v62, %v791_v61  ;;  %v2660_v10 = vpack.c.bf16 %v824_v1, %v823_v63  ;;  %v826_v25 = vld [vmem:[%s4176_s4 + $0x358] sm:$0xff]  ;;  %v845_v43 = vld [vmem:[%s4176_s4 + $0x3f0] sm:$0xff]  ;;  %v864_v55 = vld [vmem:[%s4176_s4 + $0x488] sm:$0xff]  ;;  %v98_v62 = vrot.slane %v3336_v38, %v65_v17 }
  0xe3   :  { %2617 = vmatpush3.bf16.msra.mxu0 %v2616_v3  ;;  %v627_v21 = vpop.f32.mrb[6].mxu0  ;;  %v809_v3 = vld [vmem:[%s4176_s4 + $0x2d0] sm:$0xff]  ;;  %v798_v49 = vld [vmem:[%s4176_s4 + $0x278] sm:$0xff]  ;;  %v896_v61 = vld [vmem:[%s4176_s4 + $0x588] sm:$0xff] }
  0xe4   :  { %2649 = vmatpush3.bf16.msra.mxu1 %v2648_v6  ;;  %2619 = vmatprep.subr.bf16.mxu0 %v2618_v7  ;;  %v3435_v23 = vadd.f32 %v627_v21, %v102_v26  ;;  %v629_v44 = vpop.f32.mrb[7].mxu0  ;;  %v698_v45 = vpop.f32.mrb[6].mxu1  ;;  %v841_v6 = vld [vmem:[%s4176_s4 + $0x3d0] sm:$0xff]  ;;  %v842_v7 = vld [vmem:[%s4176_s4 + $0x3d8] sm:$0xff]  ;;  %v2630_v13 = vpack.c.bf16 %v810_v5, %v809_v3  ;;  %v811_v26 = vld [vmem:[%s4176_s4 + $0x2e0] sm:$0xff]  ;;  %v2666_v21 = vpack.c.bf16 %v844_v29, %v843_v28 }
  0xe5   :  { %2651 = vmatprep.subr.bf16.mxu1 %v2650_v18  ;;  %v3446_v50 = vadd.f32 %v629_v44, %v106_v32  ;;  %v3448_v52 = vadd.f32 %v698_v45, %v110_v33  ;;  %v700_v53 = vpop.f32.mrb[7].mxu1  ;;  %v794_v18 = vld [vmem:[%s4176_s4 + $0x258] sm:$0xff]  ;;  %v2662_v20 = vpack.c.bf16 %v842_v7, %v841_v6  ;;  %v2664_v33 = vpack.c.bf16 %v826_v25, %v825_v19  ;;  %v847_v1 = vld [vmem:[%s4176_s4 + $0x400] sm:$0xff]  ;;  %v848_v3 = vld [vmem:[%s4176_s4 + $0x408] sm:$0xff] }
  0xe6   :  { %v3456_v56 = vadd.f32 %v700_v53, %v114_v36  ;;  %v2632_v32 = vpack.c.bf16 %v794_v18, %v793_v16  ;;  %v2634_v34 = vpack.c.bf16 %v812_v27, %v811_v26  ;;  %v796_v36 = vld [vmem:[%s4176_s4 + $0x268] sm:$0xff]  ;;  %v846_v44 = vld [vmem:[%s4176_s4 + $0x3f8] sm:$0xff]  ;;  %v829_v53 = vld [vmem:[%s4176_s4 + $0x370] sm:$0xff]  ;;  %v2676_v18 = vpack.c.bf16 %v848_v3, %v847_v1 }
  0xe7   :  { %2621 = vmatpush3.bf16.msra.mxu0 %v2620_v37  ;;  %v827_v37 = vld [vmem:[%s4176_s4 + $0x360] sm:$0xff]  ;;  %v2636_v45 = vpack.c.bf16 %v796_v36, %v795_v35  ;;  %v2670_v54 = vpack.c.bf16 %v846_v44, %v845_v43  ;;  %v866_v5 = vld [vmem:[%s4176_s4 + $0x498] sm:$0xff]  ;;  %v881_v26 = vld [vmem:[%s4176_s4 + $0x510] sm:$0xff] }
  0xe8   :  { %2653 = vmatpush3.bf16.msra.mxu1 %v2652_v39  ;;  %2623 = vmatprep.subr.bf16.mxu0 %v2622_v40  ;;  %v828_v39 = vld [vmem:[%s4176_s4 + $0x368] sm:$0xff]  ;;  %v813_v40 = vld [vmem:[%s4176_s4 + $0x2f0] sm:$0xff]  ;;  %v850_v25 = vld [vmem:[%s4176_s4 + $0x418] sm:$0xff] }
  0xe9   :  { %2655 = vmatprep.subr.bf16.mxu1 %v2654_v46  ;;  %v78_v46 = vrot.slane %v3297_v14, %v77_v9  ;;  %v2668_v47 = vpack.c.bf16 %v828_v39, %v827_v37  ;;  %v2638_v48 = vpack.c.bf16 %v814_v41, %v813_v40  ;;  %v830_v14 = vld [vmem:[%s4176_s4 + $0x378] sm:$0xff]  ;;  %v863_v9 = vld [vmem:[%s4176_s4 + $0x480] sm:$0xff]  ;;  %v868_v29 = vld [vmem:[%s4176_s4 + $0x4a8] sm:$0xff] }
  0xea   :  { %v882_v27 = vld [vmem:[%s4176_s4 + $0x518] sm:$0xff]  ;;  %v867_v28 = vld [vmem:[%s4176_s4 + $0x4a0] sm:$0xff]  ;;  %v852_v40 = vld [vmem:[%s4176_s4 + $0x428] sm:$0xff] }
  0xeb   :  { %2625 = vmatpush3.bf16.msra.mxu0 %v2624_v57  ;;  %v90_v57 = vrot.slane %v3336_v38, %v57_v15  ;;  %v415_v63 = vadd.f32 %v3369_v58, %v78_v46  ;;  %v2672_v15 = vpack.c.bf16 %v830_v14, %v829_v53  ;;  %v880_v38 = vld [vmem:[%s4176_s4 + $0x508] sm:$0xff]  ;;  %v865_v58 = vld [vmem:[%s4176_s4 + $0x490] sm:$0xff]  ;;  %v2712_v37 = vpack.c.bf16 %v882_v27, %v881_v26  ;;  %v851_v39 = vld [vmem:[%s4176_s4 + $0x420] sm:$0xff] }
  0xec   :  { %2657 = vmatpush3.bf16.msra.mxu1 %v2656_v59  ;;  %2627 = vmatprep.subr.bf16.mxu0 %v2626_v60  ;;  %v344_v59 = vadd.f32 %v3361_v51, %v70_v42  ;;  %v895_v60 = vld [vmem:[%s4176_s4 + $0x580] sm:$0xff]  ;;  %v2674_v51 = vpack.c.bf16 %v864_v55, %v863_v9  ;;  %v2708_v19 = vpack.c.bf16 %v880_v38, %v879_v12  ;;  %v884_v43 = vld [vmem:[%s4176_s4 + $0x528] sm:$0xff]  ;;  %v869_v44 = vld [vmem:[%s4176_s4 + $0x4b0] sm:$0xff] }
  0xed   :  { %2659 = vmatprep.subr.bf16.mxu1 %v2658_v0  ;;  %v2640_v0 = vpack.c.bf16 %v798_v49, %v797_v4  ;;  %v2706_v17 = vpack.c.bf16 %v896_v61, %v895_v60  ;;  %v488_v6 = vadd.f32 %v3393_v24, %v90_v57  ;;  %v709_v16 = vmax.f32 %v415_v63, 0.0  ;;  %v849_v24 = vld [vmem:[%s4176_s4 + $0x410] sm:$0xff]  ;;  %v883_v41 = vld [vmem:[%s4176_s4 + $0x520] sm:$0xff]  ;;  %v886_v55 = vld [vmem:[%s4176_s4 + $0x538] sm:$0xff] }
  0xee   :  { %v707_v7 = vmax.f32 %v344_v59, 0.0  ;;  %v2680_v36 = vpack.c.bf16 %v850_v25, %v849_v24  ;;  %v901_v46 = vld [vmem:[%s4176_s4 + $0x5b0] sm:$0xff]  ;;  %v2716_v4 = vpack.c.bf16 %v884_v43, %v883_v41  ;;  %v871_v57 = vld [vmem:[%s4176_s4 + $0x4c0] sm:$0xff]  ;;  %v872_v59 = vld [vmem:[%s4176_s4 + $0x4c8] sm:$0xff] }
  0xef   :  { %2629 = vmatpush3.bf16.msra.mxu0 %v2628_v8  ;;  %v897_v8 = vld [vmem:[%s4176_s4 + $0x590] sm:$0xff]  ;;  %v903_v60 = vld [vmem:[%s4176_s4 + $0x5c0] sm:$0xff]  ;;  %v904_v61 = vld [vmem:[%s4176_s4 + $0x5c8] sm:$0xff] }
  0xf0   :  { %2661 = vmatpush3.bf16.msra.mxu1 %v2660_v10  ;;  %2631 = vmatprep.subr.bf16.mxu0 %v2630_v13  ;;  %v898_v10 = vld [vmem:[%s4176_s4 + $0x598] sm:$0xff]  ;;  %v559_v13 = vadd.f32 %v3409_v31, %v98_v62  ;;  %v853_v53 = vld [vmem:[%s4176_s4 + $0x430] sm:$0xff]  ;;  %v887_v1 = vld [vmem:[%s4176_s4 + $0x540] sm:$0xff]  ;;  %v2722_v3 = vpack.c.bf16 %v904_v61, %v903_v60 }
  0xf1   :  { %2663 = vmatprep.subr.bf16.mxu1 %v2662_v20  ;;  %v2678_v20 = vpack.c.bf16 %v866_v5, %v865_v58  ;;  %v2710_v31 = vpack.c.bf16 %v898_v10, %v897_v8  ;;  %v885_v14 = vld [vmem:[%s4176_s4 + $0x530] sm:$0xff]  ;;  %v888_v12 = vld [vmem:[%s4176_s4 + $0x548] sm:$0xff]  ;;  %v874_v38 = vld [vmem:[%s4176_s4 + $0x4d8] sm:$0xff] }
  0xf2   :  { %v714_v35 = vmax.f32 %v559_v13, 0.0  ;;  %v2720_v63 = vpack.c.bf16 %v886_v55, %v885_v14  ;;  %v905_v58 = vld [vmem:[%s4176_s4 + $0x5d0] sm:$0xff]  ;;  %v906_v5 = vld [vmem:[%s4176_s4 + $0x5d8] sm:$0xff]  ;;  %v876_v24 = vld [vmem:[%s4176_s4 + $0x4e8] sm:$0xff] }
  0xf3   :  { %2633 = vmatpush3.bf16.msra.mxu0 %v2632_v32  ;;  %v712_v32 = vmax.f32 %v488_v6, 0.0  ;;  %v857_v10 = vld [vmem:[%s4176_s4 + $0x450] sm:$0xff]  ;;  %v858_v13 = vld [vmem:[%s4176_s4 + $0x458] sm:$0xff]  ;;  %v907_v25 = vld [vmem:[%s4176_s4 + $0x5e0] sm:$0xff] }
  0xf4   :  { %2665 = vmatpush3.bf16.msra.mxu1 %v2664_v33  ;;  %2635 = vmatprep.subr.bf16.mxu0 %v2634_v34  ;;  %v899_v33 = vld [vmem:[%s4176_s4 + $0x5a0] sm:$0xff]  ;;  %v900_v34 = vld [vmem:[%s4176_s4 + $0x5a8] sm:$0xff]  ;;  %v861_v43 = vld [vmem:[%s4176_s4 + $0x470] sm:$0xff] }
  0xf5   :  { %2667 = vmatprep.subr.bf16.mxu1 %v2666_v21  ;;  %v2682_v21 = vpack.c.bf16 %v868_v29, %v867_v28  ;;  %v2714_v42 = vpack.c.bf16 %v900_v34, %v899_v33  ;;  %v908_v26 = vld [vmem:[%s4176_s4 + $0x5e8] sm:$0xff]  ;;  %v859_v29 = vld [vmem:[%s4176_s4 + $0x460] sm:$0xff] }
  0xf6   :  { %v891_v33 = vld [vmem:[%s4176_s4 + $0x560] sm:$0xff]  ;;  %v2730_v34 = vpack.c.bf16 %v908_v26, %v907_v25  ;;  %v944_v61 = vld [vmem:[%s4176_s4 + $0x708] sm:$0xff] }
  0xf7   :  { %2637 = vmatpush3.bf16.msra.mxu0 %v2636_v45  ;;  %v870_v45 = vld [vmem:[%s4176_s4 + $0x4b8] sm:$0xff]  ;;  %v911_v55 = vld [vmem:[%s4176_s4 + $0x600] sm:$0xff]  ;;  %v948_v26 = vld [vmem:[%s4176_s4 + $0x728] sm:$0xff] }
  0xf8   :  { %2669 = vmatpush3.bf16.msra.mxu1 %v2668_v47  ;;  %2639 = vmatprep.subr.bf16.mxu0 %v2638_v48  ;;  %v902_v47 = vld [vmem:[%s4176_s4 + $0x5b8] sm:$0xff]  ;;  %v2684_v48 = vpack.c.bf16 %v852_v40, %v851_v39  ;;  %v2686_v49 = vpack.c.bf16 %v870_v45, %v869_v44  ;;  %v893_v45 = vld [vmem:[%s4176_s4 + $0x570] sm:$0xff]  ;;  %v947_v25 = vld [vmem:[%s4176_s4 + $0x720] sm:$0xff] }
  0xf9   :  { %2671 = vmatprep.subr.bf16.mxu1 %v2670_v54  ;;  %v854_v54 = vld [vmem:[%s4176_s4 + $0x438] sm:$0xff]  ;;  %v2718_v9 = vpack.c.bf16 %v902_v47, %v901_v46 }
  0xfa   :  { %v2688_v62 = vpack.c.bf16 %v854_v54, %v853_v53  ;;  %v910_v39 = vld [vmem:[%s4176_s4 + $0x5f8] sm:$0xff]  ;;  %v960_v53 = vld [vmem:[%s4176_s4 + $0x788] sm:$0xff] }
  0xfb   :  { %2641 = vmatpush3.bf16.msra.mxu0 %v2640_v0  ;;  %v2690_v0 = vpack.c.bf16 %v872_v59, %v871_v57  ;;  %v862_v44 = vld [vmem:[%s4176_s4 + $0x478] sm:$0xff]  ;;  %v912_v57 = vld [vmem:[%s4176_s4 + $0x608] sm:$0xff]  ;;  %v943_v59 = vld [vmem:[%s4176_s4 + $0x700] sm:$0xff] }
  0xfc   :  { %2673 = vmatpush3.bf16.msra.mxu1 %v2672_v15  ;;  %2675 = vmatprep.subr.bf16.mxu0 %v2674_v51  ;;  %v855_v15 = vld [vmem:[%s4176_s4 + $0x440] sm:$0xff]  ;;  %v856_v51 = vld [vmem:[%s4176_s4 + $0x448] sm:$0xff]  ;;  %v894_v47 = vld [vmem:[%s4176_s4 + $0x578] sm:$0xff]  ;;  %v2704_v54 = vpack.c.bf16 %v862_v44, %v861_v43 }
  0xfd   :  { %2707 = vmatprep.subr.bf16.mxu1 %v2706_v17  ;;  %v873_v17 = vld [vmem:[%s4176_s4 + $0x4d0] sm:$0xff]  ;;  %v2692_v6 = vpack.c.bf16 %v856_v51, %v855_v15  ;;  %v2736_v14 = vpack.c.bf16 %v894_v47, %v893_v45  ;;  %v962_v51 = vld [vmem:[%s4176_s4 + $0x798] sm:$0xff]  ;;  %v968_v43 = vld [vmem:[%s4176_s4 + $0x7c8] sm:$0xff] }
  0xfe   :  { %1187 = vmatmul.mubr.f32.vlgmr.msra.gmra.mrb[10].mxu0 %v707_v7  ;;  %v2724_v7 = vpack.c.bf16 %v888_v12, %v887_v1  ;;  %v2694_v8 = vpack.c.bf16 %v874_v38, %v873_v17  ;;  %v961_v15 = vld [vmem:[%s4176_s4 + $0x790] sm:$0xff]  ;;  %v713_v1 = vmax.f32 %v3407_v30, 0.0  ;;  %v2772_v12 = vpack.c.bf16 %v944_v61, %v943_v59  ;;  %v914_v38 = vld [vmem:[%s4176_s4 + $0x618] sm:$0xff]  ;;  %v919_v47 = vld [vmem:[%s4176_s4 + $0x640] sm:$0xff] }
  0xff   :  { %2677 = vmatpush3.bf16.msra.mxu0 %v2676_v18  ;;  %1257 = vmatmul.mubr.f32.vlgmr.msra.gmra.mrb[10].mxu1 %v709_v16  ;;  %v889_v16 = vld [vmem:[%s4176_s4 + $0x550] sm:$0xff]  ;;  %v2726_v18 = vpack.c.bf16 %v906_v5, %v905_v58  ;;  %v2774_v30 = vpack.c.bf16 %v962_v51, %v961_v15  ;;  %v946_v5 = vld [vmem:[%s4176_s4 + $0x718] sm:$0xff]  ;;  %v939_v51 = vld [vmem:[%s4176_s4 + $0x6e0] sm:$0xff] }
 0x100   :  { %2709 = vmatpush3.bf16.msra.mxu1 %v2708_v19  ;;  %2679 = vmatprep.subr.bf16.mxu0 %v2678_v20  ;;  %v890_v19 = vld [vmem:[%s4176_s4 + $0x558] sm:$0xff]  ;;  %v875_v20 = vld [vmem:[%s4176_s4 + $0x4e0] sm:$0xff]  ;;  %v945_v58 = vld [vmem:[%s4176_s4 + $0x710] sm:$0xff] }
 0x101   :  { %2711 = vmatprep.subr.bf16.mxu1 %v2710_v31  ;;  %1326 = vmatprep.mubr.f32.mxu0 %v712_v32  ;;  %v2696_v31 = vpack.c.bf16 %v858_v13, %v857_v10  ;;  %v2728_v27 = vpack.c.bf16 %v890_v19, %v889_v16  ;;  %v2698_v28 = vpack.c.bf16 %v876_v24, %v875_v20  ;;  %v860_v32 = vld [vmem:[%s4176_s4 + $0x468] sm:$0xff]  ;;  %v963_v10 = vld [vmem:[%s4176_s4 + $0x7a0] sm:$0xff]  ;;  %v718_v16 = vmax.f32 %v3456_v56, 0.0  ;;  %v921_v61 = vld [vmem:[%s4176_s4 + $0x650] sm:$0xff] }
 0x102   :  { %1396 = vmatprep.mubr.f32.mxu1 %v714_v35  ;;  %v892_v35 = vld [vmem:[%s4176_s4 + $0x568] sm:$0xff]  ;;  %v2700_v40 = vpack.c.bf16 %v860_v32, %v859_v29  ;;  %v2776_v19 = vpack.c.bf16 %v946_v5, %v945_v58  ;;  %v966_v29 = vld [vmem:[%s4176_s4 + $0x7b8] sm:$0xff]  ;;  %v923_v58 = vld [vmem:[%s4176_s4 + $0x660] sm:$0xff] }
 0x103   :  { %2681 = vmatpush3.bf16.msra.mxu0 %v2680_v36  ;;  %v877_v36 = vld [vmem:[%s4176_s4 + $0x4f0] sm:$0xff]  ;;  %v2732_v41 = vpack.c.bf16 %v892_v35, %v891_v33  ;;  %v964_v13 = vld [vmem:[%s4176_s4 + $0x7a8] sm:$0xff]  ;;  %v2780_v33 = vpack.c.bf16 %v948_v26, %v947_v25  ;;  %v954_v15 = vld [vmem:[%s4176_s4 + $0x758] sm:$0xff] }
 0x104   :  { %2713 = vmatpush3.bf16.msra.mxu1 %v2712_v37  ;;  %2683 = vmatprep.subr.bf16.mxu0 %v2682_v21  ;;  %v878_v37 = vld [vmem:[%s4176_s4 + $0x4f8] sm:$0xff]  ;;  %v909_v21 = vld [vmem:[%s4176_s4 + $0x5f0] sm:$0xff]  ;;  %v916_v24 = vld [vmem:[%s4176_s4 + $0x628] sm:$0xff]  ;;  %v2778_v56 = vpack.c.bf16 %v964_v13, %v963_v10 }
 0x105   :  { %2715 = vmatprep.subr.bf16.mxu1 %v2714_v42  ;;  %v2702_v42 = vpack.c.bf16 %v878_v37, %v877_v36  ;;  %v2734_v46 = vpack.c.bf16 %v910_v39, %v909_v21  ;;  %v917_v35 = vld [vmem:[%s4176_s4 + $0x630] sm:$0xff]  ;;  %v918_v36 = vld [vmem:[%s4176_s4 + $0x638] sm:$0xff]  ;;  %v955_v5 = vld [vmem:[%s4176_s4 + $0x760] sm:$0xff] }
 0x106   :  { %v949_v37 = vld [vmem:[%s4176_s4 + $0x730] sm:$0xff]  ;;  %v950_v39 = vld [vmem:[%s4176_s4 + $0x738] sm:$0xff]  ;;  %v2752_v44 = vpack.c.bf16 %v918_v36, %v917_v35  ;;  %v715_v36 = vmax.f32 %v3435_v23, 0.0 }
 0x107   :  { %2685 = vmatpush3.bf16.msra.mxu0 %v2684_v48  ;;  %v927_v48 = vld [vmem:[%s4176_s4 + $0x680] sm:$0xff]  ;;  %v2784_v45 = vpack.c.bf16 %v950_v39, %v949_v37  ;;  %v942_v10 = vld [vmem:[%s4176_s4 + $0x6f8] sm:$0xff]  ;;  %v973_v13 = vld [vmem:[%s4176_s4 + $0x7f0] sm:$0xff]  ;;  %v717_v37 = vmax.f32 %v3448_v52, 0.0  ;;  %v2911_v52 = vmov 1.0  }
 0x108   :  { %2717 = vmatpush3.bf16.msra.mxu1 %v2716_v4  ;;  %2687 = vmatprep.subr.bf16.mxu0 %v2686_v49  ;;  %v928_v4 = vld [vmem:[%s4176_s4 + $0x688] sm:$0xff]  ;;  %v959_v49 = vld [vmem:[%s4176_s4 + $0x780] sm:$0xff]  ;;  %v957_v25 = vld [vmem:[%s4176_s4 + $0x770] sm:$0xff] }
 0x109   :  { %2719 = vmatprep.subr.bf16.mxu1 %v2718_v9  ;;  %v2738_v9 = vpack.c.bf16 %v928_v4, %v927_v48  ;;  %v2770_v60 = vpack.c.bf16 %v960_v53, %v959_v49  ;;  %v920_v48 = vld [vmem:[%s4176_s4 + $0x648] sm:$0xff]  ;;  %v951_v4 = vld [vmem:[%s4176_s4 + $0x740] sm:$0xff]  ;;  %v958_v26 = vld [vmem:[%s4176_s4 + $0x778] sm:$0xff] }
 0x10a   :  { %v952_v53 = vld [vmem:[%s4176_s4 + $0x748] sm:$0xff]  ;;  %v1667_v35 = vld [vmem:[%s4179_s7 + $0x18] sm:$0xff] }
 0x10b   :  { %2689 = vmatpush3.bf16.msra.mxu0 %v2688_v62  ;;  %v929_v62 = vld [vmem:[%s4176_s4 + $0x690] sm:$0xff]  ;;  %v2788_v59 = vpack.c.bf16 %v952_v53, %v951_v4  ;;  %v1576_v4 = vpop.permute.xlu1 %1575  ;;  %v1676_v53 = vld [vmem:[%s4179_s7 + $0x60] sm:$0xff] }
 0x10c   :  { %2721 = vmatpush3.bf16.msra.mxu1 %v2720_v63  ;;  %2691 = vmatprep.subr.bf16.mxu0 %v2690_v0  ;;  %v930_v63 = vld [vmem:[%s4176_s4 + $0x698] sm:$0xff]  ;;  %v711_v0 = vmax.f32 %v3391_v22, 0.0  ;;  %v913_v22 = vld [vmem:[%s4176_s4 + $0x610] sm:$0xff] }
 0x10d   :  { %2723 = vmatprep.subr.bf16.mxu1 %v2722_v3  ;;  %v2740_v3 = vpack.c.bf16 %v912_v57, %v911_v55  ;;  %v2742_v17 = vpack.c.bf16 %v930_v63, %v929_v62  ;;  %v970_v55 = vld [vmem:[%s4176_s4 + $0x7d8] sm:$0xff]  ;;  %v2756_v57 = vpack.c.bf16 %v920_v48, %v919_v47  ;;  %v953_v63 = vld [vmem:[%s4176_s4 + $0x750] sm:$0xff] }
 0x10e   :  { %v922_v62 = vld [vmem:[%s4176_s4 + $0x658] sm:$0xff]  ;;  %v1674_v47 = vld [vmem:[%s4179_s7 + $0x50] sm:$0xff] }
 0x10f   :  { %2693 = vmatpush3.bf16.msra.mxu0 %v2692_v6  ;;  %v931_v6 = vld [vmem:[%s4176_s4 + $0x6a0] sm:$0xff]  ;;  %v1675_v48 = vld [vmem:[%s4179_s7 + $0x58] sm:$0xff] }
 0x110   :  { %2725 = vmatpush3.bf16.msra.mxu1 %v2724_v7  ;;  %2695 = vmatprep.subr.bf16.mxu0 %v2694_v8  ;;  %v932_v7 = vld [vmem:[%s4176_s4 + $0x6a8] sm:$0xff]  ;;  %v716_v8 = vmax.f32 %v3446_v50, 0.0  ;;  %v915_v50 = vld [vmem:[%s4176_s4 + $0x620] sm:$0xff] }
 0x111   :  { %2727 = vmatprep.subr.bf16.mxu1 %v2726_v18  ;;  %v2744_v18 = vpack.c.bf16 %v914_v38, %v913_v22  ;;  %v2746_v20 = vpack.c.bf16 %v932_v7, %v931_v6  ;;  %v2748_v32 = vpack.c.bf16 %v916_v24, %v915_v50  ;;  %v2792_v22 = vpack.c.bf16 %v954_v15, %v953_v63  ;;  %v956_v7 = vld [vmem:[%s4176_s4 + $0x768] sm:$0xff]  ;;  %v925_v50 = vld [vmem:[%s4176_s4 + $0x670] sm:$0xff]  ;;  %v926_v24 = vld [vmem:[%s4176_s4 + $0x678] sm:$0xff] }
 0x113   :  { %2697 = vmatpush3.bf16.msra.mxu0 %v2696_v31  ;;  %v933_v31 = vld [vmem:[%s4176_s4 + $0x6b0] sm:$0xff] }
 0x114   :  { %2729 = vmatpush3.bf16.msra.mxu1 %v2728_v27  ;;  %2699 = vmatprep.subr.bf16.mxu0 %v2698_v28  ;;  %v934_v27 = vld [vmem:[%s4176_s4 + $0x6b8] sm:$0xff]  ;;  %v965_v28 = vld [vmem:[%s4176_s4 + $0x7b0] sm:$0xff] }
 0x115   :  { %2731 = vmatprep.subr.bf16.mxu1 %v2730_v34  ;;  %v2750_v34 = vpack.c.bf16 %v934_v27, %v933_v31  ;;  %v2782_v21 = vpack.c.bf16 %v966_v29, %v965_v28  ;;  %v1664_v31 = vld [vmem:[%s4179_s7] sm:$0xff]  ;;  %v1665_v27 = vld [vmem:[%s4179_s7 + $0x8] sm:$0xff]  ;;  %v2768_v28 = vpack.c.bf16 %v926_v24, %v925_v50  ;;  %v2800_v29 = vpack.c.bf16 %v958_v26, %v957_v25 }
 0x117   :  { %2701 = vmatpush3.bf16.msra.mxu0 %v2700_v40  ;;  %v935_v40 = vld [vmem:[%s4176_s4 + $0x6c0] sm:$0xff] }
 0x118   :  { %2733 = vmatpush3.bf16.msra.mxu1 %v2732_v41  ;;  %2703 = vmatprep.subr.bf16.mxu0 %v2702_v42  ;;  %v936_v41 = vld [vmem:[%s4176_s4 + $0x6c8] sm:$0xff]  ;;  %v967_v42 = vld [vmem:[%s4176_s4 + $0x7c0] sm:$0xff] }
 0x119   :  { %2735 = vmatprep.subr.bf16.mxu1 %v2734_v46  ;;  %v2754_v46 = vpack.c.bf16 %v936_v41, %v935_v40  ;;  %v2786_v49 = vpack.c.bf16 %v968_v43, %v967_v42  ;;  %v1669_v40 = vld [vmem:[%s4179_s7 + $0x28] sm:$0xff]  ;;  %v1670_v41 = vld [vmem:[%s4179_s7 + $0x30] sm:$0xff]  ;;  %v1671_v42 = vld [vmem:[%s4179_s7 + $0x38] sm:$0xff] }
 0x11a   :  { %v2814_v43 = vpack.c.bf16 %v1671_v42, %v1670_v41 }
 0x11b   :  { %2705 = vmatpush3.bf16.msra.mxu0 %v2704_v54  ;;  %v937_v54 = vld [vmem:[%s4176_s4 + $0x6d0] sm:$0xff] }
 0x11c   :  { %2737 = vmatpush3.bf16.msra.mxu1 %v2736_v14  ;;  %2739 = vmatprep.subr.bf16.mxu0 %v2738_v9  ;;  %v938_v14 = vld [vmem:[%s4176_s4 + $0x6d8] sm:$0xff]  ;;  %v969_v9 = vld [vmem:[%s4176_s4 + $0x7d0] sm:$0xff] }
 0x11d   :  { %2771 = vmatprep.subr.bf16.mxu1 %v2770_v60  ;;  %v2758_v60 = vpack.c.bf16 %v938_v14, %v937_v54  ;;  %v1677_v54 = vld [vmem:[%s4179_s7 + $0x68] sm:$0xff] }
 0x11e   :  { %1327 = vmatmul.mubr.f32.vlgmr.msra.gmra.mrb[12].mxu0 %v711_v0  ;;  %v2790_v0 = vpack.c.bf16 %v970_v55, %v969_v9  ;;  %v2826_v9 = vpack.c.bf16 %v1677_v54, %v1676_v53  ;;  %v1678_v55 = vld [vmem:[%s4179_s7 + $0x70] sm:$0xff] }
 0x11f   :  { %2741 = vmatpush3.bf16.msra.mxu0 %v2740_v3  ;;  %1397 = vmatmul.mubr.f32.vlgmr.msra.gmra.mrb[12].mxu1 %v713_v1  ;;  %v940_v1 = vld [vmem:[%s4176_s4 + $0x6e8] sm:$0xff]  ;;  %v971_v3 = vld [vmem:[%s4176_s4 + $0x7e0] sm:$0xff] }
 0x120   :  { %2773 = vmatpush3.bf16.msra.mxu1 %v2772_v12  ;;  %2743 = vmatprep.subr.bf16.mxu0 %v2742_v17  ;;  %v972_v12 = vld [vmem:[%s4176_s4 + $0x7e8] sm:$0xff]  ;;  %v2760_v17 = vpack.c.bf16 %v922_v62, %v921_v61  ;;  %v2762_v38 = vpack.c.bf16 %v940_v1, %v939_v51 }
 0x121   :  { %2775 = vmatprep.subr.bf16.mxu1 %v2774_v30  ;;  %1466 = vmatprep.mubr.f32.mxu0 %v716_v8  ;;  %v924_v30 = vld [vmem:[%s4176_s4 + $0x668] sm:$0xff]  ;;  %v2794_v6 = vpack.c.bf16 %v972_v12, %v971_v3  ;;  %v941_v8 = vld [vmem:[%s4176_s4 + $0x6f0] sm:$0xff] }
 0x122   :  { %1536 = vmatprep.mubr.f32.mxu1 %v718_v16  ;;  %v974_v16 = vld [vmem:[%s4176_s4 + $0x7f8] sm:$0xff] }
 0x123   :  { %2745 = vmatpush3.bf16.msra.mxu0 %v2744_v18  ;;  %v2764_v18 = vpack.c.bf16 %v924_v30, %v923_v58  ;;  %v2076_v30 = vld [vmem:[%s4180_s5] ss:$0 sm:$0xff] }
 0x124   :  { %2777 = vmatpush3.bf16.msra.mxu1 %v2776_v19  ;;  %2747 = vmatprep.subr.bf16.mxu0 %v2746_v20  ;;  %v2796_v19 = vpack.c.bf16 %v956_v7, %v955_v5  ;;  %v2766_v20 = vpack.c.bf16 %v942_v10, %v941_v8 }
 0x125   :  { %2779 = vmatprep.subr.bf16.mxu1 %v2778_v56  ;;  %v2798_v56 = vpack.c.bf16 %v974_v16, %v973_v13 }
 0x127   :  { %2749 = vmatpush3.bf16.msra.mxu0 %v2748_v32  ;;  %v2802_v32 = vpack.c.bf16 %v1665_v27, %v1664_v31 }
 0x128   :  { %2781 = vmatpush3.bf16.msra.mxu1 %v2780_v33  ;;  %2751 = vmatprep.subr.bf16.mxu0 %v2750_v34  ;;  %v3953_v33 = vand.u32 127, %v51_v11  ;;  %v1666_v34 = vld [vmem:[%s4179_s7 + $0x10] sm:$0xff]  ;;  %v1668_v11 = vld [vmem:[%s4179_s7 + $0x20] sm:$0xff] }
 0x129   :  { %2783 = vmatprep.subr.bf16.mxu1 %v2782_v21  ;;  %v1570_v21 = vpop.permute.xlu0 %1569  ;;  %v2806_v39 = vpack.c.bf16 %v1667_v35, %v1666_v34  ;;  %v2810_v23 = vpack.c.bf16 %v1669_v40, %v1668_v11 }
 0x12a   :  { %vm1616_vm1 = vcmp.eq.s32.totalorder %v3953_v33, %v1570_v21  ;;  %vm1618_vm2 = vcmp.eq.s32.totalorder %v3953_v33, %v1576_v4 }
 0x12b   :  { %2753 = vmatpush3.bf16.msra.mxu0 %v2752_v44  ;;  %v1672_v44 = vld [vmem:[%s4179_s7 + $0x40] sm:$0xff] }
 0x12c   :  { %2785 = vmatpush3.bf16.msra.mxu1 %v2784_v45  ;;  %2755 = vmatprep.subr.bf16.mxu0 %v2754_v46  ;;  %v1673_v45 = vld [vmem:[%s4179_s7 + $0x48] sm:$0xff] }
 0x12d   :  { %2787 = vmatprep.subr.bf16.mxu1 %v2786_v49  ;;  %v2818_v46 = vpack.c.bf16 %v1673_v45, %v1672_v44  ;;  %v2822_v49 = vpack.c.bf16 %v1675_v48, %v1674_v47  ;;  %v1573_v14 = vpop.permute.xlu0 %1572 }
 0x12e   :  { %vm1617_vm3 = vcmp.eq.s32.totalorder %v3953_v33, %v1573_v14 }
 0x12f   :  { %2757 = vmatpush3.bf16.msra.mxu0 %v2756_v57  ;;  %v1679_v57 = vld [vmem:[%s4179_s7 + $0x78] sm:$0xff] }
 0x130   :  { %2789 = vmatpush3.bf16.msra.mxu1 %v2788_v59  ;;  %2759 = vmatprep.subr.bf16.mxu0 %v2758_v60  ;;  %v1579_v59 = vpop.permute.xlu1 %1578  ;;  %v2830_v60 = vpack.c.bf16 %v1679_v57, %v1678_v55 }
 0x131   :  { %2791 = vmatprep.subr.bf16.mxu1 %v2790_v0  ;;  %v1582_v61 = vpop.permute.xlu0 %1581  ;;  %vm1619_vm4 = vcmp.eq.s32.totalorder %v3953_v33, %v1579_v59 }
 0x132   :  { %vm1620_vm5 = vcmp.eq.s32.totalorder %v3953_v33, %v1582_v61 }
 0x133   :  { %2761 = vmatpush3.bf16.msra.mxu0 %v2760_v17 }
 0x134   :  { %2793 = vmatpush3.bf16.msra.mxu1 %v2792_v22  ;;  %2763 = vmatprep.subr.bf16.mxu0 %v2762_v38  ;;  %v1585_v62 = vpop.permute.xlu1 %1584 }
 0x135   :  { %2795 = vmatprep.subr.bf16.mxu1 %v2794_v6  ;;  %v1588_v63 = vpop.permute.xlu0 %1587  ;;  %vm1621_vm6 = vcmp.eq.s32.totalorder %v3953_v33, %v1585_v62 }
 0x136   :  { %vm1622_vm7 = vcmp.eq.s32.totalorder %v3953_v33, %v1588_v63 }
 0x137   :  { %2765 = vmatpush3.bf16.msra.mxu0 %v2764_v18 }
 0x138   :  { %2797 = vmatpush3.bf16.msra.mxu1 %v2796_v19  ;;  %2767 = vmatprep.subr.bf16.mxu0 %v2766_v20  ;;  %v1591_v0 = vpop.permute.xlu1 %1590 }
 0x139   :  { %2799 = vmatprep.subr.bf16.mxu1 %v2798_v56  ;;  %v1594_v15 = vpop.permute.xlu0 %1593  ;;  %vm1623_vm8 = vcmp.eq.s32.totalorder %v3953_v33, %v1591_v0 }
 0x13a   :  { %vm1624_vm9 = vcmp.eq.s32.totalorder %v3953_v33, %v1594_v15 }
 0x13b   :  { %2769 = vmatpush3.bf16.msra.mxu0 %v2768_v28 }
 0x13c   :  { %2801 = vmatpush3.bf16.msra.mxu1 %v2800_v29  ;;  %2803 = vmatprep.subr.bf16.mxu0 %v2802_v32  ;;  %v1597_v51 = vpop.permute.xlu1 %1596 }
 0x13d   :  { %v1600_v1 = vpop.permute.xlu0 %1599  ;;  %vm1625_vm10 = vcmp.eq.s32.totalorder %v3953_v33, %v1597_v51 }
 0x13e   :  { %1467 = vmatmul.mubr.f32.vlgmr.msra.gmra.mrb[14].mxu0 %v715_v36  ;;  %vm1626_vm11 = vcmp.eq.s32.totalorder %v3953_v33, %v1600_v1 }
 0x13f   :  { %2805 = vmatpush3.bf16.msra.mxu0 %v2802_v32  ;;  %1537 = vmatmul.mubr.f32.vlgmr.msra.gmra.mrb[14].mxu1 %v717_v37 }
 0x140   :  { %2807 = vmatprep.subr.bf16.mxu0 %v2806_v39  ;;  %2487 = vmatprep.mubr.msk.f32.mxu0 %vm1616_vm1, %v2911_v52  ;;  %v1603_v3 = vpop.permute.xlu1 %1602  ;;  %vm1543_vm1 = vcmask 261120  }
 0x141   :  { %v1606_v12 = vpop.permute.xlu0 %1605  ;;  %vm1627_vm12 = vcmp.eq.s32.totalorder %v3953_v33, %v1603_v3 }
 0x142   :  { %vm1628_vm13 = vcmp.eq.s32.totalorder %v3953_v33, %v1606_v12 }
 0x143   :  { %2809 = vmatpush3.bf16.msra.mxu0 %v2806_v39 }
 0x144   :  { %2811 = vmatprep.subr.bf16.mxu0 %v2810_v23  ;;  %v1609_v17 = vpop.permute.xlu1 %1608 }
 0x145   :  { %v1612_v22 = vpop.permute.xlu0 %1611  ;;  %vm1629_vm14 = vcmp.eq.s32.totalorder %v3953_v33, %v1609_v17 }
 0x146   :  { %vm1630_vm15 = vcmp.eq.s32.totalorder %v3953_v33, %v1612_v22 }
 0x147   :  { %2813 = vmatpush3.bf16.msra.mxu0 %v2810_v23 }
 0x148   :  { %2815 = vmatprep.subr.bf16.mxu0 %v2814_v43  ;;  %v1615_v38 = vpop.permute.xlu1 %1614 }
 0x149   :  { %vm1631_vm0 = vcmp.eq.s32.totalorder %v3953_v33, %v1615_v38 }
 0x14b   :  { %2817 = vmatpush3.bf16.msra.mxu0 %v2814_v43 }
 0x14c   :  { %2819 = vmatprep.subr.bf16.mxu0 %v2818_v46 }
 0x14f   :  { %2821 = vmatpush3.bf16.msra.mxu0 %v2818_v46 }
 0x150   :  { %2823 = vmatprep.subr.bf16.mxu0 %v2822_v49 }
 0x153   :  { %2825 = vmatpush3.bf16.msra.mxu0 %v2822_v49 }
 0x154   :  { %2827 = vmatprep.subr.bf16.mxu0 %v2826_v9 }
 0x157   :  { %2829 = vmatpush3.bf16.msra.mxu0 %v2826_v9 }
 0x158   :  { %2831 = vmatprep.subr.bf16.mxu0 %v2830_v60 }
 0x15b   :  { %2833 = vmatpush3.bf16.msra.mxu0 %v2830_v60 }
 0x15e   :  { %2488 = vmatmul.mubr.msk.f32.vlgmr.msra.gmra.mrb[16].mxu0 %vm1617_vm3, %v2911_v52  ;;  %vm4125_vm3 = vmpackc.low %vm1543_vm1, %vm1543_vm1 }
 0x15f   :  { %2490 = vmatprep.mubr.msk.f32.mxu0 %vm1618_vm2, %v2911_v52  ;;  %vm2913_vm2 = vmmov 0  }
 0x160   :  { %2543 = vmatprep.mubr.msk.f32.mxu1 %vm2913_vm2, %v2909_v2 }
 0x162   :  { %2491 = vmatmul.mubr.msk.f32.gmra.mrb[18].mxu0 %vm1619_vm4, %v2911_v52 }
 0x163   :  { %2493 = vmatprep.mubr.msk.f32.mxu0 %vm1620_vm5, %v2911_v52 }
 0x166   :  { %2494 = vmatmul.mubr.msk.f32.gmra.mrb[20].mxu0 %vm1621_vm6, %v2911_v52 }
 0x167   :  { %2496 = vmatprep.mubr.msk.f32.mxu0 %vm1622_vm7, %v2911_v52 }
 0x16a   :  { %2497 = vmatmul.mubr.msk.f32.gmra.mrb[22].mxu0 %vm1623_vm8, %v2911_v52 }
 0x16b   :  { %2499 = vmatprep.mubr.msk.f32.mxu0 %vm1624_vm9, %v2911_v52 }
 0x16e   :  { %2500 = vmatmul.mubr.msk.f32.gmra.mrb[24].mxu0 %vm1625_vm10, %v2911_v52 }
 0x16f   :  { %2502 = vmatprep.mubr.msk.f32.mxu0 %vm1626_vm11, %v2911_v52 }
 0x172   :  { %2503 = vmatmul.mubr.msk.f32.gmra.mrb[26].mxu0 %vm1627_vm12, %v2911_v52 }
 0x173   :  { %2505 = vmatprep.mubr.msk.f32.mxu0 %vm1628_vm13, %v2911_v52 }
 0x176   :  { %2506 = vmatmul.mubr.msk.f32.gmra.mrb[28].mxu0 %vm1629_vm14, %v2911_v52 }
 0x177   :  { %2508 = vmatprep.mubr.msk.f32.mxu0 %vm1630_vm15, %v2911_v52 }
 0x17a   :  { %2509 = vmatmul.mubr.msk.f32.gmra.mrb[30].mxu0 %vm1631_vm0, %v2911_v52 }
 0x1b1   :  { %v2158_v58 = vpop.f32.mrb[8].mxu0 }
 0x1b2   :  { %v2159_v5 = vpop.f32.mrb[9].mxu0  ;;  %v2193_v6 = vpop.f32.mrb[8].mxu1 }
 0x1b3   :  { %v2160_v7 = vadd.f32 %v2159_v5, %v2158_v58  ;;  %v2194_v8 = vpop.f32.mrb[9].mxu1 }
 0x1b4   :  { %v2195_v10 = vadd.f32 %v2194_v8, %v2193_v6 }
 0x1b5   :  { %v1049_v13 = vadd.f32 %v2160_v7, %v2076_v30 }
 0x1b7   :  { %v1119_v16 = vadd.f32 %v2195_v10, %v1049_v13 }
 0x1d1   :  { %v2228_v18 = vpop.f32.mrb[10].mxu0 }
 0x1d2   :  { %v2229_v19 = vpop.f32.mrb[11].mxu0  ;;  %v2263_v20 = vpop.f32.mrb[10].mxu1 }
 0x1d3   :  { %v2230_v50 = vadd.f32 %v2229_v19, %v2228_v18  ;;  %v2264_v24 = vpop.f32.mrb[11].mxu1 }
 0x1d4   :  { %v2265_v25 = vadd.f32 %v2264_v24, %v2263_v20 }
 0x1d5   :  { %v1189_v56 = vadd.f32 %v2230_v50, %v1119_v16 }
 0x1d7   :  { %v1259_v26 = vadd.f32 %v2265_v25, %v1189_v56 }
 0x1f1   :  { %v2298_v31 = vpop.f32.mrb[12].mxu0 }
 0x1f2   :  { %v2299_v27 = vpop.f32.mrb[13].mxu0  ;;  %v2333_v28 = vpop.f32.mrb[12].mxu1 }
 0x1f3   :  { %v2300_v29 = vadd.f32 %v2299_v27, %v2298_v31  ;;  %v2334_v32 = vpop.f32.mrb[13].mxu1 }
 0x1f4   :  { %v2335_v33 = vadd.f32 %v2334_v32, %v2333_v28 }
 0x1f5   :  { %v1329_v34 = vadd.f32 %v2300_v29, %v1259_v26  ;;  %v2912_v29 = vmov 0.0|0.0  }
 0x1f6   :  { %2834 = vmatprep.subr.bf16.mxu1 %v2912_v29 }
 0x1f7   :  { %v1399_v35 = vadd.f32 %v2335_v33, %v1329_v34 }
 0x211   :  { %v2368_v36 = vpop.f32.mrb[14].mxu0 }
 0x212   :  { %v2369_v37 = vpop.f32.mrb[15].mxu0  ;;  %v2403_v21 = vpop.f32.mrb[14].mxu1 }
 0x213   :  { %v2370_v39 = vadd.f32 %v2369_v37, %v2368_v36  ;;  %v2404_v11 = vpop.f32.mrb[15].mxu1 }
 0x214   :  { %v2405_v40 = vadd.f32 %v2404_v11, %v2403_v21 }
 0x215   :  { %v1469_v23 = vadd.f32 %v2370_v39, %v1399_v35 }
 0x217   :  { %v4034_v52 = vadd.f32 %v2405_v40, %v1469_v23 }
 0x219   :  { %v1542_v31 = vmul.f32 %v4034_v52, %v4034_v52 }
 0x21b   :  { %v1544_v28 = vsel %vm1543_vm1, %v1542_v31, 0.0 }
 0x231   :  { %v4036_v41 = vpop.f32.mrb[16].mxu0 }
 0x232   :  { %v1826_v42 = vmul.f32 %v4036_v41, %v4036_v41  ;;  %v4040_v43 = vpop.f32.mrb[17].mxu0 }
 0x233   :  { %v1825_v44 = vmul.f32 %v4040_v43, %v4040_v43 }
 0x234   :  { %v1844_v45 = vsel %vm1543_vm1, %v1826_v42, 0.0 }
 0x235   :  { %1845 = vadd.xlane.f32.xlu1 %v1844_v45  ;;  %v4045_v46 = vpop.f32.mrb[18].mxu0  ;;  %v1841_v47 = vsel %vm1543_vm1, %v1825_v44, 0.0 }
 0x236   :  { %1842 = vadd.xlane.f32.xlu0 %v1841_v47  ;;  %v4048_v48 = vpop.f32.mrb[19].mxu0  ;;  %v1828_v49 = vmul.f32 %v4045_v46, %v4045_v46 }
 0x237   :  { %v1827_v4 = vmul.f32 %v4048_v48, %v4048_v48 }
 0x238   :  { %v1850_v59 = vsel %vm1543_vm1, %v1828_v49, 0.0 }
 0x239   :  { %v4054_v53 = vpop.f32.mrb[20].mxu0  ;;  %v1847_v54 = vsel %vm1543_vm1, %v1827_v4, 0.0 }
 0x23a   :  { %1848 = vadd.xlane.f32.xlu0 %v1847_v54  ;;  %v4057_v14 = vpop.f32.mrb[21].mxu0  ;;  %v1830_v55 = vmul.f32 %v4054_v53, %v4054_v53 }
 0x23b   :  { %v1829_v9 = vmul.f32 %v4057_v14, %v4057_v14 }
 0x23c   :  { %v1856_v15 = vsel %vm1543_vm1, %v1830_v55, 0.0 }
 0x23d   :  { %v4063_v57 = vpop.f32.mrb[22].mxu0  ;;  %v1853_v60 = vsel %vm1543_vm1, %v1829_v9, 0.0 }
 0x23e   :  { %1851 = vadd.xlane.f32.xlu0 %v1850_v59  ;;  %1854 = vadd.xlane.f32.xlu1 %v1853_v60  ;;  %v4067_v61 = vpop.f32.mrb[23].mxu0  ;;  %v1832_v63 = vmul.f32 %v4063_v57, %v4063_v57 }
 0x23f   :  { %v1831_v62 = vmul.f32 %v4067_v61, %v4067_v61 }
 0x240   :  { %v1862_v22 = vsel %vm1543_vm1, %v1832_v63, 0.0 }
 0x241   :  { %v4073_v0 = vpop.f32.mrb[24].mxu0  ;;  %v1859_v51 = vsel %vm1543_vm1, %v1831_v62, 0.0 }
 0x242   :  { %1857 = vadd.xlane.f32.xlu0 %v1856_v15  ;;  %1860 = vadd.xlane.f32.xlu1 %v1859_v51  ;;  %v4077_v1 = vpop.f32.mrb[25].mxu0  ;;  %v1834_v12 = vmul.f32 %v4073_v0, %v4073_v0 }
 0x243   :  { %v1833_v3 = vmul.f32 %v4077_v1, %v4077_v1 }
 0x244   :  { %v1868_v7 = vsel %vm1543_vm1, %v1834_v12, 0.0 }
 0x245   :  { %v4083_v17 = vpop.f32.mrb[26].mxu0  ;;  %v1865_v38 = vsel %vm1543_vm1, %v1833_v3, 0.0 }
 0x246   :  { %1863 = vadd.xlane.f32.xlu0 %v1862_v22  ;;  %1866 = vadd.xlane.f32.xlu1 %v1865_v38  ;;  %v4087_v58 = vpop.f32.mrb[27].mxu0  ;;  %v1836_v5 = vmul.f32 %v4083_v17, %v4083_v17 }
 0x247   :  { %v1835_v30 = vmul.f32 %v4087_v58, %v4087_v58 }
 0x248   :  { %v1874_v19 = vsel %vm1543_vm1, %v1836_v5, 0.0 }
 0x249   :  { %v4093_v6 = vpop.f32.mrb[28].mxu0  ;;  %v1871_v8 = vsel %vm1543_vm1, %v1835_v30, 0.0 }
 0x24a   :  { %1869 = vadd.xlane.f32.xlu0 %v1868_v7  ;;  %1872 = vadd.xlane.f32.xlu1 %v1871_v8  ;;  %v4097_v10 = vpop.f32.mrb[29].mxu0  ;;  %v1838_v16 = vmul.f32 %v4093_v6, %v4093_v6 }
 0x24b   :  { %v1837_v13 = vmul.f32 %v4097_v10, %v4097_v10 }
 0x24c   :  { %v1880_v56 = vsel %vm1543_vm1, %v1838_v16, 0.0 }
 0x24d   :  { %v4103_v18 = vpop.f32.mrb[30].mxu0  ;;  %v1877_v20 = vsel %vm1543_vm1, %v1837_v13, 0.0 }
 0x24e   :  { %1875 = vadd.xlane.f32.xlu0 %v1874_v19  ;;  %1878 = vadd.xlane.f32.xlu1 %v1877_v20  ;;  %v4107_v50 = vpop.f32.mrb[31].mxu0  ;;  %v1840_v25 = vmul.f32 %v4103_v18, %v4103_v18 }
 0x24f   :  { %v1839_v24 = vmul.f32 %v4107_v50, %v4107_v50 }
 0x250   :  { %v1886_v27 = vsel %vm1543_vm1, %v1840_v25, 0.0 }
 0x251   :  { %v1883_v26 = vsel %vm1543_vm1, %v1839_v24, 0.0 }
 0x252   :  { %1881 = vadd.xlane.f32.xlu0 %v1880_v56  ;;  %1884 = vadd.xlane.f32.xlu1 %v1883_v26 }
 0x256   :  { %1887 = vadd.xlane.f32.xlu0 %v1886_v27  ;;  %1545 = vadd.xlane.f32.xlu1 %v1544_v28 }
 0x2c2   :  { %v1846_v32 = vpop.xlane.xlu1 %1845 }
 0x2c3   :  { %v1890_v33 = vmax.f32 %v1846_v32, 1e-24  ;;  %v1843_v34 = vpop.xlane.xlu0 %1842 }
 0x2c4   :  { %v1889_v35 = vmax.f32 %v1843_v34, 1e-24 }
 0x2c5   :  { %2873 = vrsqrt.f32 %v1890_v33 }
 0x2c6   :  { %2875 = vrsqrt.f32 %v1889_v35 }
 0x2c7   :  { %v1849_v36 = vpop.xlane.xlu0 %1848 }
 0x2c8   :  { %v1891_v37 = vmax.f32 %v1849_v36, 1e-24 }
 0x2ca   :  { %2877 = vrsqrt.f32 %v1891_v37 }
 0x2cb   :  { %v1852_v21 = vpop.xlane.xlu0 %1851  ;;  %v1855_v39 = vpop.xlane.xlu1 %1854 }
 0x2cc   :  { %v1892_v11 = vmax.f32 %v1852_v21, 1e-24  ;;  %v1893_v40 = vmax.f32 %v1855_v39, 1e-24 }
 0x2ce   :  { %2879 = vrsqrt.f32 %v1892_v11 }
 0x2cf   :  { %v2874_v23 = vpop.eup %2873  ;;  %v1858_v42 = vpop.xlane.xlu0 %1857  ;;  %2881 = vrsqrt.f32 %v1893_v40 }
 0x2d0   :  { %v1861_v44 = vpop.xlane.xlu1 %1860  ;;  %v2876_v45 = vpop.eup %2875  ;;  %v1922_v2 = vmul.f32 %v2874_v23, %v4036_v41  ;;  %v1894_v47 = vmax.f32 %v1858_v42, 1e-24 }
 0x2d1   :  { %v1895_v4 = vmax.f32 %v1861_v44, 1e-24  ;;  %v1921_v49 = vmul.f32 %v2876_v45, %v4040_v43 }
 0x2d2   :  { %2883 = vrsqrt.f32 %v1894_v47  ;;  %v2059_v47 = vstv %s4181_s0 }
 0x2d3   :  { %v1864_v9 = vpop.xlane.xlu0 %1863  ;;  %v2835_v59 = vpack.c.bf16 %v1922_v2, %v1921_v49  ;;  %2885 = vrsqrt.f32 %v1895_v4  ;;  %v2060_v4 = vmul.f32 1.442695, %v2059_v47 }
 0x2d4   :  { %v1867_v55 = vpop.xlane.xlu1 %1866  ;;  %v1896_v60 = vmax.f32 %v1864_v9, 1e-24  ;;  %v2878_v41 = vpop.eup %2877 }
 0x2d5   :  { %v1897_v62 = vmax.f32 %v1867_v55, 1e-24  ;;  %2837 = vmatpush3.bf16.xpose.msk.msra.mxu1 %vm4125_vm3, %v2835_v59  ;;  %v1923_v12 = vmul.f32 %v2878_v41, %v4048_v48 }
 0x2d6   :  { %2887 = vrsqrt.f32 %v1896_v60  ;;  %2838 = vmatprep.subr.bf16.mxu1 %v2912_v29 }
 0x2d7   :  { %v1870_v43 = vpop.xlane.xlu0 %1869  ;;  %2889 = vrsqrt.f32 %v1897_v62 }
 0x2d8   :  { %v1873_v63 = vpop.xlane.xlu1 %1872  ;;  %v2880_v15 = vpop.eup %2879  ;;  %v1898_v51 = vmax.f32 %v1870_v43, 1e-24 }
 0x2d9   :  { %v1899_v3 = vmax.f32 %v1873_v63, 1e-24  ;;  %v1924_v22 = vmul.f32 %v2880_v15, %v4045_v46  ;;  %v2882_v38 = vpop.eup %2881 }
 0x2da   :  { %2891 = vrsqrt.f32 %v1898_v51  ;;  %v1925_v19 = vmul.f32 %v2882_v38, %v4057_v14 }
 0x2db   :  { %v1876_v30 = vpop.xlane.xlu0 %1875  ;;  %v2839_v7 = vpack.c.bf16 %v1924_v22, %v1923_v12  ;;  %2893 = vrsqrt.f32 %v1899_v3 }
 0x2dc   :  { %v1879_v5 = vpop.xlane.xlu1 %1878  ;;  %v2884_v8 = vpop.eup %2883  ;;  %v1900_v13 = vmax.f32 %v1876_v30, 1e-24 }
 0x2dd   :  { %v1901_v16 = vmax.f32 %v1879_v5, 1e-24  ;;  %v1926_v20 = vmul.f32 %v2884_v8, %v4054_v53  ;;  %2841 = vmatpush3.bf16.xpose.msk.msra.mxu1 %vm4125_vm3, %v2839_v7  ;;  %v2886_v24 = vpop.eup %2885 }
 0x2de   :  { %2895 = vrsqrt.f32 %v1900_v13  ;;  %2842 = vmatprep.subr.bf16.mxu1 %v2912_v29  ;;  %v1927_v27 = vmul.f32 %v2886_v24, %v4067_v61 }
 0x2df   :  { %v1882_v46 = vpop.xlane.xlu0 %1881  ;;  %v2843_v25 = vpack.c.bf16 %v1926_v20, %v1925_v19  ;;  %2897 = vrsqrt.f32 %v1901_v16 }
 0x2e0   :  { %v1885_v48 = vpop.xlane.xlu1 %1884  ;;  %v2888_v56 = vpop.eup %2887  ;;  %v1902_v26 = vmax.f32 %v1882_v46, 1e-24 }
 0x2e1   :  { %v1903_v31 = vmax.f32 %v1885_v48, 1e-24  ;;  %v1928_v14 = vmul.f32 %v2888_v56, %v4063_v57  ;;  %v2890_v28 = vpop.eup %2889 }
 0x2e2   :  { %2899 = vrsqrt.f32 %v1902_v26  ;;  %v1929_v35 = vmul.f32 %v2890_v28, %v4077_v1 }
 0x2e3   :  { %v1888_v53 = vpop.xlane.xlu0 %1887  ;;  %v2847_v32 = vpack.c.bf16 %v1928_v14, %v1927_v27  ;;  %2901 = vrsqrt.f32 %v1903_v31 }
 0x2e4   :  { %v2892_v33 = vpop.eup %2891  ;;  %v1904_v34 = vmax.f32 %v1888_v53, 1e-24 }
 0x2e5   :  { %v1930_v36 = vmul.f32 %v2892_v33, %v4073_v0  ;;  %2845 = vmatpush3.bf16.xpose.msk.msra.mxu1 %vm4125_vm3, %v2843_v25  ;;  %v2894_v37 = vpop.eup %2893 }
 0x2e6   :  { %2903 = vrsqrt.f32 %v1904_v34  ;;  %2846 = vmatprep.subr.bf16.mxu1 %v2912_v29  ;;  %v1931_v21 = vmul.f32 %v2894_v37, %v4087_v58 }
 0x2e7   :  { %v2851_v61 = vpack.c.bf16 %v1930_v36, %v1929_v35 }
 0x2e8   :  { %v2896_v57 = vpop.eup %2895 }
 0x2e9   :  { %v1932_v39 = vmul.f32 %v2896_v57, %v4083_v17  ;;  %v2898_v11 = vpop.eup %2897 }
 0x2ea   :  { %v1933_v1 = vmul.f32 %v2898_v11, %v4097_v10 }
 0x2eb   :  { %v2855_v40 = vpack.c.bf16 %v1932_v39, %v1931_v21 }
 0x2ec   :  { %v2900_v23 = vpop.eup %2899 }
 0x2ed   :  { %v1934_v0 = vmul.f32 %v2900_v23, %v4093_v6  ;;  %2849 = vmatpush3.bf16.xpose.msk.msra.mxu1 %vm4125_vm3, %v2847_v32  ;;  %v2902_v42 = vpop.eup %2901  ;;  %v1546_v6 = vpop.xlane.xlu1 %1545 }
 0x2ee   :  { %2850 = vmatprep.subr.bf16.mxu1 %v2912_v29  ;;  %v1935_v2 = vmul.f32 %v2902_v42, %v4107_v50  ;;  %v1547_v10 = vmax.f32 %v1546_v6, 1e-24 }
 0x2ef   :  { %v2859_v44 = vpack.c.bf16 %v1934_v0, %v1933_v1 }
 0x2f0   :  { %v2904_v45 = vpop.eup %2903  ;;  %2905 = vrsqrt.f32 %v1547_v10 }
 0x2f1   :  { %v1936_v58 = vmul.f32 %v2904_v45, %v4103_v18  ;;  %2907 = vpow2.f32 %v2060_v4 }
 0x2f3   :  { %v2863_v17 = vpack.c.bf16 %v1936_v58, %v1935_v2 }
 0x2f5   :  { %2853 = vmatpush3.bf16.xpose.msk.msra.mxu1 %vm4125_vm3, %v2851_v61 }
 0x2f6   :  { %2854 = vmatprep.subr.bf16.mxu1 %v2912_v29 }
 0x2fa   :  { %v2906_v18 = vpop.eup %2905 }
 0x2fb   :  { %v1549_v50 = vmul.f32 %v2906_v18, %v4034_v52  ;;  %v2908_v49 = vpop.eup %2907 }
 0x2fd   :  { %2857 = vmatpush3.bf16.xpose.msk.msra.mxu1 %vm4125_vm3, %v2855_v40 }
 0x2fe   :  { %2858 = vmatprep.subr.bf16.mxu1 %v2912_v29 }
 0x305   :  { %2861 = vmatpush3.bf16.xpose.msk.msra.mxu1 %vm4125_vm3, %v2859_v44 }
 0x306   :  { %2862 = vmatprep.subr.bf16.mxu1 %v2912_v29 }
 0x30d   :  { %2865 = vmatpush3.bf16.xpose.msk.msra.mxu1 %vm4125_vm3, %v2863_v17 }
 0x314   :  { %2544 = vmatmul.mubr.msk.f32.vlgmr.msra.gmra.mrb[16].mxu1 %vm1543_vm1, %v1549_v50 }
 0x3e7   :  { %v2054_v9 = vpop.f32.mrb[16].mxu1 }
 0x3e8   :  { %v2062_v55 = vmul.f32 %v2908_v49, %v2054_v9  ;;  %v2545_v59 = vpop.f32.mrb[17].mxu1 }
 0x3ea   :  { %2063 = vst [vmem:[%s4182_s8] sm:$0xff] %v2062_v55 }

</bundles_post_ra>
